<compile_context>
chip_gen: v5e
topology: v5e:2x2
jax: 0.10.0
libtpu: 0.0.40
codegen_flags: <defaults>
</compile_context>

<pallas_src>
import functools

import jax
import jax.numpy as jnp
from jax.experimental import pallas as pl
from jax.experimental.pallas import tpu as pltpu


# -----------------------------------------------------------------------------
# Kernel: one (batch, row-tile) per grid step
# -----------------------------------------------------------------------------
def _bottleneck_kernel(x_ref, w1_ref, b1_ref, w2_ref, b2_ref, w3_ref, b3_ref,
                       o_ref, y1p_ref):
    # x_ref   : (1, H, W, Cin)   bf16  full image (block index constant over r)
    # w1_ref  : (Cin, C)         bf16  BN1 scale folded in
    # w2_ref  : (9, C, C)        bf16  BN2 scale folded in, tap = ky*3 + kx, (ci, co)
    # w3_ref  : (C, Cout)        bf16  BN3 scale folded in
    # b*_ref  : (1, C|Cout)      f32   folded BN biases
    # o_ref   : (1, TH, W, Cout) bf16  one row tile of the output
    # y1p_ref : (TH+2, W+2, C)   bf16  halo-padded conv1 activations (scratch)
    TH, W, Cout = o_ref.shape[1], o_ref.shape[2], o_ref.shape[3]
    Cin = x_ref.shape[3]
    C = w1_ref.shape[1]
    f32 = jnp.float32

    r = pl.program_id(1)
    n_r = pl.num_programs(1)
    rs = pl.multiple_of(r * TH, TH)          # first output row of this tile

    # ---- zero ONLY the scratch border strips (interior is fully overwritten).
    # Re-done every step -> safe under megacore grid sharding.
    zrow = jnp.zeros((1, W + 2, C), y1p_ref.dtype)
    zcol = jnp.zeros((TH + 2, 1, C), y1p_ref.dtype)
    y1p_ref[0:1, :, :] = zrow
    y1p_ref[TH + 1:TH + 2, :, :] = zrow
    y1p_ref[:, 0:1, :] = zcol
    y1p_ref[:, W + 1:W + 2, :] = zcol

    def conv1(rows_2d):                      # (M, Cin) bf16 -> (M, C) f32
        y = jnp.dot(rows_2d, w1_ref[...], preferred_element_type=f32)
        return jnp.maximum(y + b1_ref[...], 0.0)

    # ---- conv1 (1x1) + bn1 + relu: TH core rows of this tile
    xc = x_ref[:, pl.ds(rs, TH)].reshape(TH * W, Cin)
    y1c = conv1(xc)
    y1p_ref[1:TH + 1, 1:W + 1, :] = y1c.reshape(TH, W, C).astype(y1p_ref.dtype)

    # ---- 1-row halos, recomputed from x (rows outside the image stay zero)
    @pl.when(r > 0)
    def _top():
        xt = x_ref[:, pl.ds(rs - 1, 1)].reshape(W, Cin)
        y1p_ref[0:1, 1:W + 1, :] = conv1(xt).reshape(1, W, C).astype(y1p_ref.dtype)

    @pl.when(r < n_r - 1)
    def _bottom():
        xb = x_ref[:, pl.ds(rs + TH, 1)].reshape(W, Cin)
        y1p_ref[TH + 1:TH + 2, 1:W + 1, :] = (
            conv1(xb).reshape(1, W, C).astype(y1p_ref.dtype))

    # ---- conv2 (3x3, pad=1) + bn2 + relu: 9 accumulating MXU dots, f32 acc.
    # (bf16 scratch: y1 is cast once on store; taps are MXU-native operands.)
    y1p = y1p_ref[...]
    acc = jnp.zeros((TH * W, C), f32)
    for dy in range(3):
        for dx in range(3):
            tap = y1p[dy:dy + TH, dx:dx + W, :].reshape(TH * W, C)
            acc = acc + jnp.dot(tap, w2_ref[dy * 3 + dx],
                                preferred_element_type=f32)
    y2 = jnp.maximum(acc + b2_ref[...], 0.0).astype(jnp.bfloat16)

    # ---- conv3 (1x1) + bn3 + residual + relu
    y3 = jnp.dot(y2, w3_ref[...], preferred_element_type=f32) + b3_ref[...]
    xres = x_ref[:, pl.ds(rs, TH)].reshape(TH * W, Cin).astype(f32)   # re-read
    o_ref[...] = (jnp.maximum(y3 + xres, 0.0)
                  .reshape(1, TH, W, Cout).astype(o_ref.dtype))


# -----------------------------------------------------------------------------
# Parameter init (PyTorch layouts) and BN folding
# -----------------------------------------------------------------------------
def _fold_bn(gamma, beta, mean, var, eps=1e-5):
    scale = gamma / jnp.sqrt(var + eps)
    bias = beta - mean * scale
    return scale[None, :], bias[None, :]          # (1, C)


def init_params(key, inplanes, planes):
    ks = jax.random.split(key, 8)
    f32 = jnp.float32

    def bn(k, c):
        k1, k2, k3, k4 = jax.random.split(k, 4)
        gamma = 1.0 + 0.1 * jax.random.normal(k1, (c,), f32)
        beta = 0.1 * jax.random.normal(k2, (c,), f32)
        mean = 0.1 * jax.random.normal(k3, (c,), f32)
        var = 0.5 + 0.5 * jnp.abs(jax.random.normal(k4, (c,), f32))
        return _fold_bn(gamma, beta, mean, var)

    p = {}
    # PyTorch conv weight layout: (Cout, Cin, kH, kW)
    p["w1"] = 0.1 * jax.random.normal(ks[0], (planes, inplanes, 1, 1), f32)
    p["w2"] = 0.1 * jax.random.normal(ks[1], (planes, planes, 3, 3), f32)
    p["w3"] = 0.1 * jax.random.normal(ks[2], (planes * 4, planes, 1, 1), f32)
    p["s1"], p["b1"] = bn(ks[3], planes)
    p["s2"], p["b2"] = bn(ks[4], planes)
    p["s3"], p["b3"] = bn(ks[5], planes * 4)
    return p


def fold_params(params):
    """One-time prep: fold BN scales into bf16 weights; biases stay f32."""
    bf16 = jnp.bfloat16
    s1, s2, s3 = params["s1"][0], params["s2"][0], params["s3"][0]
    w1 = (params["w1"][:, :, 0, 0] * s1[:, None]).T.astype(bf16)       # (Cin, C)
    C = w1.shape[1]
    w2 = params["w2"] * s2[:, None, None, None]                        # (co,ci,ky,kx)
    w2 = jnp.transpose(w2, (2, 3, 1, 0)).reshape(9, C, C).astype(bf16) # tap,(ci,co)
    w3 = (params["w3"][:, :, 0, 0] * s3[:, None]).T.astype(bf16)       # (C, Cout)
    return {"w1": w1, "b1": params["b1"], "w2": w2, "b2": params["b2"],
            "w3": w3, "b3": params["b3"]}


# -----------------------------------------------------------------------------
# Forward wrapper (NHWC in, NHWC out, bf16 activations end-to-end)
# -----------------------------------------------------------------------------
@functools.partial(jax.jit, static_argnames=("row_tile",))
def bottleneck_forward(x, fp, *, row_tile=8):
    N, H, W, Cin = x.shape
    Cin_w, C = fp["w1"].shape
    Cout = fp["w3"].shape[1]
    assert Cin == Cin_w and Cout == 4 * C and Cin == Cout, \
        "identity-residual Bottleneck requires inplanes == planes * 4"
    TH = row_tile if H % row_tile == 0 else H
    n_r = H // TH

    x = x.astype(jnp.bfloat16)

    # VMEM limit from the per-step footprint (double-buffered blocks + weights
    # + scratch + live f32 values), accounting for 128-lane physical padding,
    # clamped to v7x's 64 MiB physical VMEM.
    lane = lambda c: max(c, 128)
    bf2, f4 = 2, 4
    est = (2 * (H * W * lane(Cin) * bf2                    # x block (x2 buf)
                + TH * W * lane(Cout) * bf2                # out block
                + (Cin * lane(C) + 9 * C * lane(C) + C * lane(Cout)) * bf2
                + (2 * lane(C) + lane(Cout)) * f4)
           + (TH + 2) * (W + 2) * lane(C) * bf2            # halo scratch
           + TH * W * (3 * lane(C) + 2 * lane(Cout)) * f4) # live f32 values
    vmem_limit = int(min(max(2 * est, 32 << 20), 64 << 20))

    return pl.pallas_call(
        _bottleneck_kernel,
        out_shape=jax.ShapeDtypeStruct((N, H, W, Cout), jnp.bfloat16),
        grid=(N, n_r),
        in_specs=[
            pl.BlockSpec((1, H, W, Cin), lambda n, r: (n, 0, 0, 0)),
            pl.BlockSpec((Cin, C), lambda n, r: (0, 0)),
            pl.BlockSpec((1, C), lambda n, r: (0, 0)),
            pl.BlockSpec((9, C, C), lambda n, r: (0, 0, 0)),
            pl.BlockSpec((1, C), lambda n, r: (0, 0)),
            pl.BlockSpec((C, Cout), lambda n, r: (0, 0)),
            pl.BlockSpec((1, Cout), lambda n, r: (0, 0)),
        ],
        out_specs=pl.BlockSpec((1, TH, W, Cout), lambda n, r: (n, r, 0, 0)),
        scratch_shapes=[pltpu.VMEM((TH + 2, W + 2, C), jnp.bfloat16)],
        compiler_params=pltpu.CompilerParams(
            dimension_semantics=("parallel", "parallel"),
            vmem_limit_bytes=vmem_limit,
        ),
    )(x, fp["w1"], fp["b1"], fp["w2"], fp["b2"], fp["w3"], fp["b3"])


# -----------------------------------------------------------------------------
# Pure-JAX reference with the same folded bf16 weights / bf16 activations /
# f32 accumulation, for an apples-to-apples correctness check.
# -----------------------------------------------------------------------------
def reference_forward(x, fp):
    f32, bf16 = jnp.float32, jnp.bfloat16
    x = x.astype(bf16)
    N, H, W, _ = x.shape
    C = fp["w1"].shape[1]

    y1 = jnp.einsum("nhwc,cd->nhwd", x, fp["w1"], preferred_element_type=f32)
    y1 = jnp.maximum(y1 + fp["b1"][0], 0.0).astype(bf16)

    y1p = jnp.pad(y1, ((0, 0), (1, 1), (1, 1), (0, 0)))
    acc = jnp.zeros((N, H, W, C), f32)
    for dy in range(3):
        for dx in range(3):
            acc = acc + jnp.einsum("nhwc,cd->nhwd",
                                   y1p[:, dy:dy + H, dx:dx + W, :],
                                   fp["w2"][dy * 3 + dx],
                                   preferred_element_type=f32)
    y2 = jnp.maximum(acc + fp["b2"][0], 0.0).astype(bf16)

    y3 = jnp.einsum("nhwc,cd->nhwd", y2, fp["w3"], preferred_element_type=f32)
    out = jnp.maximum(y3 + fp["b3"][0] + x.astype(f32), 0.0)
    return out.astype(bf16)


if __name__ == "__main__":
    key = jax.random.PRNGKey(0)
    k_x, k_p = jax.random.split(key)

    N, H, W = 2, 16, 16
    planes = 32
    inplanes = planes * 4          # identity residual requires inplanes == planes*4

    # NHWC bf16 activations end-to-end (no NCHW<->NHWC transposes).
    x = jax.random.normal(k_x, (N, H, W, inplanes), jnp.float32).astype(jnp.bfloat16)
    params = init_params(k_p, inplanes, planes)
    fp = fold_params(params)

    out = jax.block_until_ready(bottleneck_forward(x, fp))
    ref = reference_forward(x, fp)

    assert out.shape == (N, H, W, 4 * planes), out.shape
    assert out.dtype == jnp.bfloat16, out.dtype
    err = float(jnp.max(jnp.abs(out.astype(jnp.float32) - ref.astype(jnp.float32))))
    assert jnp.allclose(out.astype(jnp.float32), ref.astype(jnp.float32),
                        rtol=5e-2, atol=5e-2), err

    print("KERNEL_OK")
</pallas_src>

<mosaic_0001>
module attributes {stable_mosaic.version = 11 : i64} {
  func.func @_bottleneck_kernel(%arg0: i32, %arg1: i32, %arg2: memref<1x16x16x128xbf16, #tpu.memory_space<vmem>>, %arg3: memref<128x32xbf16, #tpu.memory_space<vmem>>, %arg4: memref<1x32xf32, #tpu.memory_space<vmem>>, %arg5: memref<9x32x32xbf16, #tpu.memory_space<vmem>>, %arg6: memref<1x32xf32, #tpu.memory_space<vmem>>, %arg7: memref<32x128xbf16, #tpu.memory_space<vmem>>, %arg8: memref<1x128xf32, #tpu.memory_space<vmem>>, %arg9: memref<1x8x16x128xbf16, #tpu.memory_space<vmem>>, %arg10: memref<10x18x32xbf16, #tpu.memory_space<vmem>>) attributes {dimension_semantics = [#tpu.dimension_semantics<parallel>, #tpu.dimension_semantics<parallel>], iteration_bounds = array<i64: 2, 2>, scalar_prefetch = 0 : i64, scratch_operands = 1 : i64, tpu.core_type = #tpu.core_type<tc>, window_params = [{transform_indices = @transform_0, window_bounds = array<i64: 1, 16, 16, 128>}, {pipeline_mode = #tpu.pipeline_mode<synchronous>, transform_indices = @transform_1, window_bounds = array<i64: 128, 32>}, {pipeline_mode = #tpu.pipeline_mode<synchronous>, transform_indices = @transform_2, window_bounds = array<i64: 1, 32>}, {pipeline_mode = #tpu.pipeline_mode<synchronous>, transform_indices = @transform_3, window_bounds = array<i64: 9, 32, 32>}, {pipeline_mode = #tpu.pipeline_mode<synchronous>, transform_indices = @transform_4, window_bounds = array<i64: 1, 32>}, {pipeline_mode = #tpu.pipeline_mode<synchronous>, transform_indices = @transform_5, window_bounds = array<i64: 32, 128>}, {pipeline_mode = #tpu.pipeline_mode<synchronous>, transform_indices = @transform_6, window_bounds = array<i64: 1, 128>}, {transform_indices = @transform_7, window_bounds = array<i64: 1, 8, 16, 128>}]} {
    %c8_i32 = arith.constant 8 : i32
    %0 = arith.muli %arg1, %c8_i32 : i32
    %1 = tpu.assume_multiple %0, 8 : i32
    %cst = arith.constant 0.000000e+00 : bf16
    %2 = vector.broadcast %cst : bf16 to vector<1x18x32xbf16>
    %cst_0 = arith.constant 0.000000e+00 : bf16
    %3 = vector.broadcast %cst_0 : bf16 to vector<10x1x32xbf16>
    %c0 = arith.constant 0 : index
    %c0_1 = arith.constant 0 : index
    %c0_2 = arith.constant 0 : index
    %4 = vector.load %arg10[%c0, %c0_1, %c0_2] : memref<10x18x32xbf16, #tpu.memory_space<vmem>>, vector<1x18x32xbf16>
    tpu.vector_store %arg10[%c0, %c0_1, %c0_2], %2 {strides = array<i32>} : memref<10x18x32xbf16, #tpu.memory_space<vmem>>, vector<1x18x32xbf16>,
    %c9 = arith.constant 9 : index
    %c0_3 = arith.constant 0 : index
    %c0_4 = arith.constant 0 : index
    %5 = vector.load %arg10[%c9, %c0_3, %c0_4] : memref<10x18x32xbf16, #tpu.memory_space<vmem>>, vector<1x18x32xbf16>
    tpu.vector_store %arg10[%c9, %c0_3, %c0_4], %2 {strides = array<i32>} : memref<10x18x32xbf16, #tpu.memory_space<vmem>>, vector<1x18x32xbf16>,
    %c0_5 = arith.constant 0 : index
    %c0_6 = arith.constant 0 : index
    %c0_7 = arith.constant 0 : index
    %6 = vector.load %arg10[%c0_5, %c0_6, %c0_7] : memref<10x18x32xbf16, #tpu.memory_space<vmem>>, vector<10x1x32xbf16>
    tpu.vector_store %arg10[%c0_5, %c0_6, %c0_7], %3 {strides = array<i32>} : memref<10x18x32xbf16, #tpu.memory_space<vmem>>, vector<10x1x32xbf16>,
    %c0_8 = arith.constant 0 : index
    %c17 = arith.constant 17 : index
    %c0_9 = arith.constant 0 : index
    %7 = vector.load %arg10[%c0_8, %c17, %c0_9] : memref<10x18x32xbf16, #tpu.memory_space<vmem>>, vector<10x1x32xbf16>
    tpu.vector_store %arg10[%c0_8, %c17, %c0_9], %3 {strides = array<i32>} : memref<10x18x32xbf16, #tpu.memory_space<vmem>>, vector<10x1x32xbf16>,
    %c0_10 = arith.constant 0 : index
    %8 = arith.index_cast %1 : i32 to index
    %c0_11 = arith.constant 0 : index
    %c0_12 = arith.constant 0 : index
    %9 = vector.load %arg2[%c0_10, %8, %c0_11, %c0_12] : memref<1x16x16x128xbf16, #tpu.memory_space<vmem>>, vector<1x8x16x128xbf16>
    %10 = vector.shape_cast %9 : vector<1x8x16x128xbf16> to vector<128x128xbf16>
    %c0_13 = arith.constant 0 : index
    %c0_14 = arith.constant 0 : index
    %11 = vector.load %arg3[%c0_13, %c0_14] : memref<128x32xbf16, #tpu.memory_space<vmem>>, vector<128x32xbf16>
    %cst_15 = arith.constant dense<0.000000e+00> : vector<128x32xf32>
    %12 = tpu.matmul %10, %11, %cst_15 {dimension_numbers = #tpu.dot_dimension_numbers<[1], [0], [0], [1], [0, 0, 1, 1], [], []>} : vector<128x128xbf16>, vector<128x32xbf16>, vector<128x32xf32> -> vector<128x32xf32>
    %c0_16 = arith.constant 0 : index
    %c0_17 = arith.constant 0 : index
    %13 = vector.load %arg4[%c0_16, %c0_17] : memref<1x32xf32, #tpu.memory_space<vmem>>, vector<1x32xf32>
    %14 = vector.broadcast %13 : vector<1x32xf32> to vector<128x32xf32>
    %15 = arith.addf %12, %14 : vector<128x32xf32>
    %cst_18 = arith.constant 0.000000e+00 : f32
    %16 = vector.broadcast %cst_18 : f32 to vector<128x32xf32>
    %17 = arith.maximumf %15, %16 : vector<128x32xf32>
    %18 = vector.shape_cast %17 : vector<128x32xf32> to vector<8x16x32xf32>
    %19 = arith.truncf %18 : vector<8x16x32xf32> to vector<8x16x32xbf16>
    %c1 = arith.constant 1 : index
    %c1_19 = arith.constant 1 : index
    %c0_20 = arith.constant 0 : index
    %20 = vector.load %arg10[%c1, %c1_19, %c0_20] : memref<10x18x32xbf16, #tpu.memory_space<vmem>>, vector<8x16x32xbf16>
    tpu.vector_store %arg10[%c1, %c1_19, %c0_20], %19 {strides = array<i32>} : memref<10x18x32xbf16, #tpu.memory_space<vmem>>, vector<8x16x32xbf16>,
    %c0_i32 = arith.constant 0 : i32
    %21 = arith.cmpi sgt, %arg1, %c0_i32 : i32
    %22 = arith.extui %21 : i1 to i32
    %c0_i32_21 = arith.constant 0 : i32
    %23 = arith.cmpi ne, %22, %c0_i32_21 : i32
    scf.if %23 {
      %c1_i32_72 = arith.constant 1 : i32
      %104 = arith.subi %1, %c1_i32_72 : i32
      %c0_73 = arith.constant 0 : index
      %105 = arith.index_cast %104 : i32 to index
      %c0_74 = arith.constant 0 : index
      %c0_75 = arith.constant 0 : index
      %106 = vector.load %arg2[%c0_73, %105, %c0_74, %c0_75] : memref<1x16x16x128xbf16, #tpu.memory_space<vmem>>, vector<1x1x16x128xbf16>
      %107 = vector.shape_cast %106 : vector<1x1x16x128xbf16> to vector<16x128xbf16>
      %c0_76 = arith.constant 0 : index
      %c0_77 = arith.constant 0 : index
      %108 = vector.load %arg3[%c0_76, %c0_77] : memref<128x32xbf16, #tpu.memory_space<vmem>>, vector<128x32xbf16>
      %cst_78 = arith.constant dense<0.000000e+00> : vector<16x32xf32>
      %109 = tpu.matmul %107, %108, %cst_78 {dimension_numbers = #tpu.dot_dimension_numbers<[1], [0], [0], [1], [0, 0, 1, 1], [], []>} : vector<16x128xbf16>, vector<128x32xbf16>, vector<16x32xf32> -> vector<16x32xf32>
      %c0_79 = arith.constant 0 : index
      %c0_80 = arith.constant 0 : index
      %110 = vector.load %arg4[%c0_79, %c0_80] : memref<1x32xf32, #tpu.memory_space<vmem>>, vector<1x32xf32>
      %111 = vector.broadcast %110 : vector<1x32xf32> to vector<16x32xf32>
      %112 = arith.addf %109, %111 : vector<16x32xf32>
      %cst_81 = arith.constant 0.000000e+00 : f32
      %113 = vector.broadcast %cst_81 : f32 to vector<16x32xf32>
      %114 = arith.maximumf %112, %113 : vector<16x32xf32>
      %115 = vector.shape_cast %114 : vector<16x32xf32> to vector<1x16x32xf32>
      %116 = arith.truncf %115 : vector<1x16x32xf32> to vector<1x16x32xbf16>
      %c0_82 = arith.constant 0 : index
      %c1_83 = arith.constant 1 : index
      %c0_84 = arith.constant 0 : index
      %117 = vector.load %arg10[%c0_82, %c1_83, %c0_84] : memref<10x18x32xbf16, #tpu.memory_space<vmem>>, vector<1x16x32xbf16>
      tpu.vector_store %arg10[%c0_82, %c1_83, %c0_84], %116 {strides = array<i32>} : memref<10x18x32xbf16, #tpu.memory_space<vmem>>, vector<1x16x32xbf16>,
    } else {
    }
    %c1_i32 = arith.constant 1 : i32
    %24 = arith.cmpi slt, %arg1, %c1_i32 : i32
    %25 = arith.extui %24 : i1 to i32
    %c0_i32_22 = arith.constant 0 : i32
    %26 = arith.cmpi ne, %25, %c0_i32_22 : i32
    scf.if %26 {
      %c8_i32_72 = arith.constant 8 : i32
      %104 = arith.addi %1, %c8_i32_72 : i32
      %c0_73 = arith.constant 0 : index
      %105 = arith.index_cast %104 : i32 to index
      %c0_74 = arith.constant 0 : index
      %c0_75 = arith.constant 0 : index
      %106 = vector.load %arg2[%c0_73, %105, %c0_74, %c0_75] : memref<1x16x16x128xbf16, #tpu.memory_space<vmem>>, vector<1x1x16x128xbf16>
      %107 = vector.shape_cast %106 : vector<1x1x16x128xbf16> to vector<16x128xbf16>
      %c0_76 = arith.constant 0 : index
      %c0_77 = arith.constant 0 : index
      %108 = vector.load %arg3[%c0_76, %c0_77] : memref<128x32xbf16, #tpu.memory_space<vmem>>, vector<128x32xbf16>
      %cst_78 = arith.constant dense<0.000000e+00> : vector<16x32xf32>
      %109 = tpu.matmul %107, %108, %cst_78 {dimension_numbers = #tpu.dot_dimension_numbers<[1], [0], [0], [1], [0, 0, 1, 1], [], []>} : vector<16x128xbf16>, vector<128x32xbf16>, vector<16x32xf32> -> vector<16x32xf32>
      %c0_79 = arith.constant 0 : index
      %c0_80 = arith.constant 0 : index
      %110 = vector.load %arg4[%c0_79, %c0_80] : memref<1x32xf32, #tpu.memory_space<vmem>>, vector<1x32xf32>
      %111 = vector.broadcast %110 : vector<1x32xf32> to vector<16x32xf32>
      %112 = arith.addf %109, %111 : vector<16x32xf32>
      %cst_81 = arith.constant 0.000000e+00 : f32
      %113 = vector.broadcast %cst_81 : f32 to vector<16x32xf32>
      %114 = arith.maximumf %112, %113 : vector<16x32xf32>
      %115 = vector.shape_cast %114 : vector<16x32xf32> to vector<1x16x32xf32>
      %116 = arith.truncf %115 : vector<1x16x32xf32> to vector<1x16x32xbf16>
      %c9_82 = arith.constant 9 : index
      %c1_83 = arith.constant 1 : index
      %c0_84 = arith.constant 0 : index
      %117 = vector.load %arg10[%c9_82, %c1_83, %c0_84] : memref<10x18x32xbf16, #tpu.memory_space<vmem>>, vector<1x16x32xbf16>
      tpu.vector_store %arg10[%c9_82, %c1_83, %c0_84], %116 {strides = array<i32>} : memref<10x18x32xbf16, #tpu.memory_space<vmem>>, vector<1x16x32xbf16>,
    } else {
    }
    %c0_23 = arith.constant 0 : index
    %c0_24 = arith.constant 0 : index
    %c0_25 = arith.constant 0 : index
    %27 = vector.load %arg10[%c0_23, %c0_24, %c0_25] : memref<10x18x32xbf16, #tpu.memory_space<vmem>>, vector<10x18x32xbf16>
    %cst_26 = arith.constant 0.000000e+00 : f32
    %28 = vector.broadcast %cst_26 : f32 to vector<128x32xf32>
    %29 = vector.extract_strided_slice %27 {offsets = [0, 0, 0], sizes = [8, 16, 32], strides = [1, 1, 1]} : vector<10x18x32xbf16> to vector<8x16x32xbf16>
    %30 = vector.shape_cast %29 : vector<8x16x32xbf16> to vector<128x32xbf16>
    %c0_27 = arith.constant 0 : index
    %c0_28 = arith.constant 0 : index
    %c0_29 = arith.constant 0 : index
    %31 = vector.load %arg5[%c0_27, %c0_28, %c0_29] : memref<9x32x32xbf16, #tpu.memory_space<vmem>>, vector<1x32x32xbf16>
    %32 = vector.shape_cast %31 : vector<1x32x32xbf16> to vector<32x32xbf16>
    %cst_30 = arith.constant dense<0.000000e+00> : vector<128x32xf32>
    %33 = tpu.matmul %30, %32, %cst_30 {dimension_numbers = #tpu.dot_dimension_numbers<[1], [0], [0], [1], [0, 0, 1, 1], [], []>} : vector<128x32xbf16>, vector<32x32xbf16>, vector<128x32xf32> -> vector<128x32xf32>
    %34 = arith.addf %28, %33 : vector<128x32xf32>
    %35 = vector.extract_strided_slice %27 {offsets = [0, 1, 0], sizes = [8, 16, 32], strides = [1, 1, 1]} : vector<10x18x32xbf16> to vector<8x16x32xbf16>
    %36 = vector.shape_cast %35 : vector<8x16x32xbf16> to vector<128x32xbf16>
    %c1_31 = arith.constant 1 : index
    %c0_32 = arith.constant 0 : index
    %c0_33 = arith.constant 0 : index
    %37 = vector.load %arg5[%c1_31, %c0_32, %c0_33] : memref<9x32x32xbf16, #tpu.memory_space<vmem>>, vector<1x32x32xbf16>
    %38 = vector.shape_cast %37 : vector<1x32x32xbf16> to vector<32x32xbf16>
    %cst_34 = arith.constant dense<0.000000e+00> : vector<128x32xf32>
    %39 = tpu.matmul %36, %38, %cst_34 {dimension_numbers = #tpu.dot_dimension_numbers<[1], [0], [0], [1], [0, 0, 1, 1], [], []>} : vector<128x32xbf16>, vector<32x32xbf16>, vector<128x32xf32> -> vector<128x32xf32>
    %40 = arith.addf %34, %39 : vector<128x32xf32>
    %41 = vector.extract_strided_slice %27 {offsets = [0, 2, 0], sizes = [8, 16, 32], strides = [1, 1, 1]} : vector<10x18x32xbf16> to vector<8x16x32xbf16>
    %42 = vector.shape_cast %41 : vector<8x16x32xbf16> to vector<128x32xbf16>
    %c2 = arith.constant 2 : index
    %c0_35 = arith.constant 0 : index
    %c0_36 = arith.constant 0 : index
    %43 = vector.load %arg5[%c2, %c0_35, %c0_36] : memref<9x32x32xbf16, #tpu.memory_space<vmem>>, vector<1x32x32xbf16>
    %44 = vector.shape_cast %43 : vector<1x32x32xbf16> to vector<32x32xbf16>
    %cst_37 = arith.constant dense<0.000000e+00> : vector<128x32xf32>
    %45 = tpu.matmul %42, %44, %cst_37 {dimension_numbers = #tpu.dot_dimension_numbers<[1], [0], [0], [1], [0, 0, 1, 1], [], []>} : vector<128x32xbf16>, vector<32x32xbf16>, vector<128x32xf32> -> vector<128x32xf32>
    %46 = arith.addf %40, %45 : vector<128x32xf32>
    %47 = vector.extract_strided_slice %27 {offsets = [1, 0, 0], sizes = [8, 16, 32], strides = [1, 1, 1]} : vector<10x18x32xbf16> to vector<8x16x32xbf16>
    %48 = vector.shape_cast %47 : vector<8x16x32xbf16> to vector<128x32xbf16>
    %c3 = arith.constant 3 : index
    %c0_38 = arith.constant 0 : index
    %c0_39 = arith.constant 0 : index
    %49 = vector.load %arg5[%c3, %c0_38, %c0_39] : memref<9x32x32xbf16, #tpu.memory_space<vmem>>, vector<1x32x32xbf16>
    %50 = vector.shape_cast %49 : vector<1x32x32xbf16> to vector<32x32xbf16>
    %cst_40 = arith.constant dense<0.000000e+00> : vector<128x32xf32>
    %51 = tpu.matmul %48, %50, %cst_40 {dimension_numbers = #tpu.dot_dimension_numbers<[1], [0], [0], [1], [0, 0, 1, 1], [], []>} : vector<128x32xbf16>, vector<32x32xbf16>, vector<128x32xf32> -> vector<128x32xf32>
    %52 = arith.addf %46, %51 : vector<128x32xf32>
    %53 = vector.extract_strided_slice %27 {offsets = [1, 1, 0], sizes = [8, 16, 32], strides = [1, 1, 1]} : vector<10x18x32xbf16> to vector<8x16x32xbf16>
    %54 = vector.shape_cast %53 : vector<8x16x32xbf16> to vector<128x32xbf16>
    %c4 = arith.constant 4 : index
    %c0_41 = arith.constant 0 : index
    %c0_42 = arith.constant 0 : index
    %55 = vector.load %arg5[%c4, %c0_41, %c0_42] : memref<9x32x32xbf16, #tpu.memory_space<vmem>>, vector<1x32x32xbf16>
    %56 = vector.shape_cast %55 : vector<1x32x32xbf16> to vector<32x32xbf16>
    %cst_43 = arith.constant dense<0.000000e+00> : vector<128x32xf32>
    %57 = tpu.matmul %54, %56, %cst_43 {dimension_numbers = #tpu.dot_dimension_numbers<[1], [0], [0], [1], [0, 0, 1, 1], [], []>} : vector<128x32xbf16>, vector<32x32xbf16>, vector<128x32xf32> -> vector<128x32xf32>
    %58 = arith.addf %52, %57 : vector<128x32xf32>
    %59 = vector.extract_strided_slice %27 {offsets = [1, 2, 0], sizes = [8, 16, 32], strides = [1, 1, 1]} : vector<10x18x32xbf16> to vector<8x16x32xbf16>
    %60 = vector.shape_cast %59 : vector<8x16x32xbf16> to vector<128x32xbf16>
    %c5 = arith.constant 5 : index
    %c0_44 = arith.constant 0 : index
    %c0_45 = arith.constant 0 : index
    %61 = vector.load %arg5[%c5, %c0_44, %c0_45] : memref<9x32x32xbf16, #tpu.memory_space<vmem>>, vector<1x32x32xbf16>
    %62 = vector.shape_cast %61 : vector<1x32x32xbf16> to vector<32x32xbf16>
    %cst_46 = arith.constant dense<0.000000e+00> : vector<128x32xf32>
    %63 = tpu.matmul %60, %62, %cst_46 {dimension_numbers = #tpu.dot_dimension_numbers<[1], [0], [0], [1], [0, 0, 1, 1], [], []>} : vector<128x32xbf16>, vector<32x32xbf16>, vector<128x32xf32> -> vector<128x32xf32>
    %64 = arith.addf %58, %63 : vector<128x32xf32>
    %65 = vector.extract_strided_slice %27 {offsets = [2, 0, 0], sizes = [8, 16, 32], strides = [1, 1, 1]} : vector<10x18x32xbf16> to vector<8x16x32xbf16>
    %66 = vector.shape_cast %65 : vector<8x16x32xbf16> to vector<128x32xbf16>
    %c6 = arith.constant 6 : index
    %c0_47 = arith.constant 0 : index
    %c0_48 = arith.constant 0 : index
    %67 = vector.load %arg5[%c6, %c0_47, %c0_48] : memref<9x32x32xbf16, #tpu.memory_space<vmem>>, vector<1x32x32xbf16>
    %68 = vector.shape_cast %67 : vector<1x32x32xbf16> to vector<32x32xbf16>
    %cst_49 = arith.constant dense<0.000000e+00> : vector<128x32xf32>
    %69 = tpu.matmul %66, %68, %cst_49 {dimension_numbers = #tpu.dot_dimension_numbers<[1], [0], [0], [1], [0, 0, 1, 1], [], []>} : vector<128x32xbf16>, vector<32x32xbf16>, vector<128x32xf32> -> vector<128x32xf32>
    %70 = arith.addf %64, %69 : vector<128x32xf32>
    %71 = vector.extract_strided_slice %27 {offsets = [2, 1, 0], sizes = [8, 16, 32], strides = [1, 1, 1]} : vector<10x18x32xbf16> to vector<8x16x32xbf16>
    %72 = vector.shape_cast %71 : vector<8x16x32xbf16> to vector<128x32xbf16>
    %c7 = arith.constant 7 : index
    %c0_50 = arith.constant 0 : index
    %c0_51 = arith.constant 0 : index
    %73 = vector.load %arg5[%c7, %c0_50, %c0_51] : memref<9x32x32xbf16, #tpu.memory_space<vmem>>, vector<1x32x32xbf16>
    %74 = vector.shape_cast %73 : vector<1x32x32xbf16> to vector<32x32xbf16>
    %cst_52 = arith.constant dense<0.000000e+00> : vector<128x32xf32>
    %75 = tpu.matmul %72, %74, %cst_52 {dimension_numbers = #tpu.dot_dimension_numbers<[1], [0], [0], [1], [0, 0, 1, 1], [], []>} : vector<128x32xbf16>, vector<32x32xbf16>, vector<128x32xf32> -> vector<128x32xf32>
    %76 = arith.addf %70, %75 : vector<128x32xf32>
    %77 = vector.extract_strided_slice %27 {offsets = [2, 2, 0], sizes = [8, 16, 32], strides = [1, 1, 1]} : vector<10x18x32xbf16> to vector<8x16x32xbf16>
    %78 = vector.shape_cast %77 : vector<8x16x32xbf16> to vector<128x32xbf16>
    %c8 = arith.constant 8 : index
    %c0_53 = arith.constant 0 : index
    %c0_54 = arith.constant 0 : index
    %79 = vector.load %arg5[%c8, %c0_53, %c0_54] : memref<9x32x32xbf16, #tpu.memory_space<vmem>>, vector<1x32x32xbf16>
    %80 = vector.shape_cast %79 : vector<1x32x32xbf16> to vector<32x32xbf16>
    %cst_55 = arith.constant dense<0.000000e+00> : vector<128x32xf32>
    %81 = tpu.matmul %78, %80, %cst_55 {dimension_numbers = #tpu.dot_dimension_numbers<[1], [0], [0], [1], [0, 0, 1, 1], [], []>} : vector<128x32xbf16>, vector<32x32xbf16>, vector<128x32xf32> -> vector<128x32xf32>
    %82 = arith.addf %76, %81 : vector<128x32xf32>
    %c0_56 = arith.constant 0 : index
    %c0_57 = arith.constant 0 : index
    %83 = vector.load %arg6[%c0_56, %c0_57] : memref<1x32xf32, #tpu.memory_space<vmem>>, vector<1x32xf32>
    %84 = vector.broadcast %83 : vector<1x32xf32> to vector<128x32xf32>
    %85 = arith.addf %82, %84 : vector<128x32xf32>
    %cst_58 = arith.constant 0.000000e+00 : f32
    %86 = vector.broadcast %cst_58 : f32 to vector<128x32xf32>
    %87 = arith.maximumf %85, %86 : vector<128x32xf32>
    %88 = arith.truncf %87 : vector<128x32xf32> to vector<128x32xbf16>
    %c0_59 = arith.constant 0 : index
    %c0_60 = arith.constant 0 : index
    %89 = vector.load %arg7[%c0_59, %c0_60] : memref<32x128xbf16, #tpu.memory_space<vmem>>, vector<32x128xbf16>
    %cst_61 = arith.constant dense<0.000000e+00> : vector<128x128xf32>
    %90 = tpu.matmul %88, %89, %cst_61 {dimension_numbers = #tpu.dot_dimension_numbers<[1], [0], [0], [1], [0, 0, 1, 1], [], []>} : vector<128x32xbf16>, vector<32x128xbf16>, vector<128x128xf32> -> vector<128x128xf32>
    %c0_62 = arith.constant 0 : index
    %c0_63 = arith.constant 0 : index
    %91 = vector.load %arg8[%c0_62, %c0_63] : memref<1x128xf32, #tpu.memory_space<vmem>>, vector<1x128xf32>
    %92 = vector.broadcast %91 : vector<1x128xf32> to vector<128x128xf32>
    %93 = arith.addf %90, %92 : vector<128x128xf32>
    %c0_64 = arith.constant 0 : index
    %94 = arith.index_cast %1 : i32 to index
    %c0_65 = arith.constant 0 : index
    %c0_66 = arith.constant 0 : index
    %95 = vector.load %arg2[%c0_64, %94, %c0_65, %c0_66] : memref<1x16x16x128xbf16, #tpu.memory_space<vmem>>, vector<1x8x16x128xbf16>
    %96 = vector.shape_cast %95 : vector<1x8x16x128xbf16> to vector<128x128xbf16>
    %97 = arith.extf %96 : vector<128x128xbf16> to vector<128x128xf32>
    %98 = arith.addf %93, %97 : vector<128x128xf32>
    %cst_67 = arith.constant 0.000000e+00 : f32
    %99 = vector.broadcast %cst_67 : f32 to vector<128x128xf32>
    %100 = arith.maximumf %98, %99 : vector<128x128xf32>
    %101 = vector.shape_cast %100 : vector<128x128xf32> to vector<1x8x16x128xf32>
    %102 = arith.truncf %101 : vector<1x8x16x128xf32> to vector<1x8x16x128xbf16>
    %c0_68 = arith.constant 0 : index
    %c0_69 = arith.constant 0 : index
    %c0_70 = arith.constant 0 : index
    %c0_71 = arith.constant 0 : index
    %103 = vector.load %arg9[%c0_68, %c0_69, %c0_70, %c0_71] : memref<1x8x16x128xbf16, #tpu.memory_space<vmem>>, vector<1x8x16x128xbf16>
    tpu.vector_store %arg9[%c0_68, %c0_69, %c0_70, %c0_71], %102 {strides = array<i32>} : memref<1x8x16x128xbf16, #tpu.memory_space<vmem>>, vector<1x8x16x128xbf16>,
    return
  }
  func.func @transform_0(%arg0: i32, %arg1: i32) -> (i32, i32, i32, i32) {
    %c0_i32 = arith.constant 0 : i32
    %c0_i32_0 = arith.constant 0 : i32
    %c0_i32_1 = arith.constant 0 : i32
    %c0_i32_2 = arith.constant 0 : i32
    return %arg0, %c0_i32, %c0_i32_0, %c0_i32_1 : i32, i32, i32, i32
  }
  func.func @transform_1(%arg0: i32, %arg1: i32) -> (i32, i32) {
    %c0_i32 = arith.constant 0 : i32
    %c0_i32_0 = arith.constant 0 : i32
    %c0_i32_1 = arith.constant 0 : i32
    return %c0_i32, %c0_i32_0 : i32, i32
  }
  func.func @transform_2(%arg0: i32, %arg1: i32) -> (i32, i32) {
    %c0_i32 = arith.constant 0 : i32
    %c0_i32_0 = arith.constant 0 : i32
    %c0_i32_1 = arith.constant 0 : i32
    return %c0_i32, %c0_i32_0 : i32, i32
  }
  func.func @transform_3(%arg0: i32, %arg1: i32) -> (i32, i32, i32) {
    %c0_i32 = arith.constant 0 : i32
    %c0_i32_0 = arith.constant 0 : i32
    %c0_i32_1 = arith.constant 0 : i32
    %c0_i32_2 = arith.constant 0 : i32
    return %c0_i32, %c0_i32_0, %c0_i32_1 : i32, i32, i32
  }
  func.func @transform_4(%arg0: i32, %arg1: i32) -> (i32, i32) {
    %c0_i32 = arith.constant 0 : i32
    %c0_i32_0 = arith.constant 0 : i32
    %c0_i32_1 = arith.constant 0 : i32
    return %c0_i32, %c0_i32_0 : i32, i32
  }
  func.func @transform_5(%arg0: i32, %arg1: i32) -> (i32, i32) {
    %c0_i32 = arith.constant 0 : i32
    %c0_i32_0 = arith.constant 0 : i32
    %c0_i32_1 = arith.constant 0 : i32
    return %c0_i32, %c0_i32_0 : i32, i32
  }
  func.func @transform_6(%arg0: i32, %arg1: i32) -> (i32, i32) {
    %c0_i32 = arith.constant 0 : i32
    %c0_i32_0 = arith.constant 0 : i32
    %c0_i32_1 = arith.constant 0 : i32
    return %c0_i32, %c0_i32_0 : i32, i32
  }
  func.func @transform_7(%arg0: i32, %arg1: i32) -> (i32, i32, i32, i32) {
    %c0_i32 = arith.constant 0 : i32
    %c0_i32_0 = arith.constant 0 : i32
    %c0_i32_1 = arith.constant 0 : i32
    return %arg0, %arg1, %c0_i32, %c0_i32_0 : i32, i32, i32, i32
  }
}

</mosaic_0001>

<bundles_post_ra>
// kernel: bottleneck_forward.1
= control target key start
LH: loop header
LB: loop body
LE: loop exit
PB: predicated region body
PF: predicated region fallthrough
CT: control target
= control target key end

     0   :  { %s4698_s0 = inlined_call_operand.hbm [shape: bf16[2,16,16,128], index: 0, kind: input, shape index: {}]   ;;  %s4699_s1 = inlined_call_operand.vmem [shape: bf16[128,32], index: 1, kind: input, shape index: {}]   ;;  %s4700_s2 = inlined_call_operand.vmem [shape: f32[1,32], index: 2, kind: input, shape index: {}]   ;;  %s4701_s3 = inlined_call_operand.hbm [shape: bf16[9,32,32], index: 3, kind: input, shape index: {}]   ;;  %s4702_s4 = inlined_call_operand.vmem [shape: f32[1,32], index: 4, kind: input, shape index: {}]   ;;  %s4703_s5 = inlined_call_operand.vmem [shape: bf16[32,128], index: 5, kind: input, shape index: {}]   ;;  %s4704_s6 = inlined_call_operand.vmem [shape: f32[1,128], index: 6, kind: input, shape index: {}]   ;;  %s4705_s7 = inlined_call_operand.hbm [shape: bf16[2,16,16,128], index: 7, kind: output, shape index: {}]  }
   0x1   :  { %4717 = sst [smem:[#allocation19_spill]] %s4701_s3 }
   0x2   :  { %4718 = sst [smem:[#allocation20_spill]] %s4702_s4 }
   0x3   :  { %4719 = sst [smem:[#allocation21_spill]] %s4703_s5 }
   0x4   :  { %4720 = sst [smem:[#allocation22_spill]] %s4704_s6 }
   0x5   :  { %4721 = sst [smem:[#allocation23_spill]] %s4705_s7 }
   0x6   :  { %12 = vsyncpa [#allocation4], 0 }
   0x7   :  { %14 = vsyncpa [#allocation4 + $0x1], 0 }
   0x8   :  { %15 = vsyncpa [#allocation7], 0 }
   0x9   :  { %16 = vsyncpa [#allocation5], 0 }
   0xa   :  { %18 = vsyncpa [#allocation5 + $0x1], 0  ;;  %s3639_s24 = smov 0   ;;  %s3641_s25 = smov 0  }
   0xb   :  { %s3643_s26 = smov 0   ;;  %s3645_s27 = smov 0  }
   0xc   :  { %s3647_s28 = smov 0   ;;  %s3649_s29 = smov 0  }
   0xd   :  { %s3651_s30 = smov 0   ;;  %s3653_s8 = smov 0  }
   0xe   :  { %s3655_s9 = smov 0   ;;  %s3657_s10 = smov 0  }
   0xf   :  { %s3659_s11 = smov 0  }
  0x10 LB: > { %4722 = sst [smem:[#allocation12_spill]] %s3551_s24  ;;  %s2721_s12 = sadd.s32 4294967295, %s3591_s11   ;;  %s3591_s11 = sphi %s3659_s11, %s24_s11   ;;  %s3587_s10 = sphi %s3657_s10, %s4768_s10   ;;  %s3583_s9 = sphi %s3655_s9, %s4759_s9   ;;  %s3579_s8 = sphi %s3653_s8, %s4767_s8   ;;  %s3575_s30 = sphi %s3651_s30, %s4758_s30   ;;  %s3571_s29 = sphi %s3649_s29, %s4766_s29   ;;  %s3567_s28 = sphi %s3647_s28, %s4765_s28   ;;  %s3563_s27 = sphi %s3645_s27, %s4764_s27   ;;  %s3559_s26 = sphi %s3643_s26, %s4763_s26   ;;  %s3555_s25 = sphi %s3641_s25, %s4762_s25   ;;  %s3551_s24 = sphi %s3639_s24, %s4761_s24  }
  0x11   : > { %4723 = sst [smem:[#allocation13_spill]] %s3579_s8  ;;  %s2722_s13 = sadd.s32 4294967294, %s3591_s11  }
  0x12   : > { %4724 = sst [smem:[#allocation14_spill]] %s3583_s9  ;;  %p56_p0 = scmp.ne.s32.totalorder %s3567_s28, %s3563_s27 }
  0x13   : > { %p3695_p1 = scmp.eq.s32.totalorder %s2721_s12, 0  ;;  %p207_p2 = scmp.ne.s32.totalorder %s3559_s26, %s3555_s25 }
  0x14   : > { %p208_p3 = scmp.eq.s32.totalorder %s2721_s12, 3  ;;  %p213_p5 = scmp.ne.s32.totalorder %s3555_s25, %s3551_s24 }
  0x15   : > { %p3703_p4 = por %p3695_p1, %p56_p0  ;;  %p214_p7 = scmp.eq.s32.totalorder %s2722_s13, 3 }
  0x16   : > { %p3709_p6 = por %p208_p3, %p207_p2  ;;  %p2723_p8 = scmp.ge.s32.totalorder %s3591_s11, 1 }
  0x17   : > { %p221_p9 = scmp.lt.s32.totalorder %s3591_s11, 5  ;;  %p3715_p10 = por %p214_p7, %p213_p5 }
  0x18   : > { %s4727_s16 = scalar_select %p3709_p6, 1, 0 }
  0x19   : > { %s4729_s17 = scalar_select %p3715_p10, 1, 0 }
  0x1a   : > { %4728 = sst [smem:[#allocation15_spill]] %s4727_s16  ;;  %p3719_p11 = pnand %p2723_p8, %p221_p9 }
  0x1b   : > { %4730 = sst [smem:[#allocation16_spill]] %s4729_s17  ;;  %s3593_s22 = smov [#allocation6]  }
  0x1c   : > { %s4732_s3 = sld [smem:[#allocation19_spill]]  ;;  %p3290_p12 = pneg %p3719_p11 }
  0x1d   : > { %s240_s23 = sshll.u32 %s3593_s22, 4  ;;  %s4706_s27 = smov 64   ;;  %s241_s23 = int_to_ptr.vmem [resolvable:$true] %s240_s23 }
  0x1e   : > { %p3291_p13 = pnand %p3290_p12, %p3695_p1  ;;  %s4707_s12 = smov 4  }
  0x1f   : > { %s33_s13 = sadd.s32 1, %s3583_s9  ;;  %s36_s19 = sadd.s32 1, %s3587_s10 }
  0x20   : > { %p34_p0 = scmp.ge.s32.totalorder %s33_s13, 2  ;;  %s43_s20 = sadd.s32 1, %s3571_s29 }
  0x21   : > { %p50_p2 = scmp.ne.s32.totalorder %s3571_s29, %s3567_s28  ;;  %p51_p3 = scmp.eq.s32.totalorder %s3591_s11, 0 }
  0x22   : > { %s238_s21 = sshll.u32 %s4732_s3, 4  ;;  %s4770_s13 = smov (%p34_p0, %s33_s13), 0  ;;  %s239_s21 = int_to_ptr.hbm [resolvable:$true] %s238_s21 }
  0x23   : > { %3293 = dma.hbm_to_vmem [thread:$0]  (!%p3291_p13), %s239_s21, 2304, %s241_s23, [#allocation7], %s4706_s27, %s4706_s27, %s4707_s12  }
  0x24   : > { %4733 = sst [smem:[#allocation17_spill]] %s4770_s13  ;;  %s4772_s19 = smov (!%p34_p0, %s36_s19), %s3587_s10 }
  0x25   : > { %p3742_p5 = por %p51_p3, %p50_p2  ;;  %s193_s3 = ssub.s32 %s3583_s9, %s4770_s13 }
  0x26   : > { %p38_p7 = scmp.ge.s32.totalorder %s4772_s19, 2  ;;  %s197_s21 = sadd.s32 1, %s3559_s26 }
  0x27   : > { %p3303_p8 = scmp.lt.s32.totalorder %s3591_s11, 4  ;;  %s263_s23 = sand.u32 1, %s3571_s29  }
  0x28   : > { %s4774_s19 = smov (%p38_p7, %s4772_s19), 0  ;;  %s2726_s27 = sshll.u32 %s263_s23, 7 }
  0x29   : > { %4735 = sst [smem:[#allocation18_spill]] %s4774_s19  ;;  %s40_s12 = ssub.s32 %s3587_s10, %s4774_s19 }
  0x2a   : > { %p41_p9 = scmp.eq.s32.totalorder %s40_s12, 0  ;;  %s194_s17 = sor.u32 %s193_s3, %s40_s12 }
  0x2b   : > { %p195_p12 = scmp.eq.s32.totalorder %s194_s17, 0  ;;  %s3098_s24 = sshll.u32 %s3587_s10, 7 }
  0x2c   : > { %s3757_s16 = scalar_select %p41_p9, %s3571_s29, %s43_s20  }
  0x2d   : > { %s3760_s7 = scalar_select %p195_p12, %s3559_s26, %s197_s21  }
  0x2e   : > { %s272_s8 = scalar_lea.hbm %s4698_s0, %s3098_s24  ;;  %s267_s6 = scalar_lea.vmem [#allocation3], %s2726_s27 }
  0x2f   : > { %s275_s4 = sshll.u32 %s267_s6, 4  ;;  %s273_s5 = sshll.u32 %s272_s8, 4  ;;  %s276_s4 = int_to_ptr.vmem [resolvable:$true] %s275_s4  ;;  %s274_s5 = int_to_ptr.hbm [resolvable:$true] %s273_s5 }
  0x30   : > { %p3295_p13 = pnand %p3303_p8, %p3742_p5  ;;  %s264_s19 = scalar_lea.sflag [#allocation4], %s263_s23 }
  0x31   : > { %s4736_s3 = smov 4   ;;  %s4737_s17 = smov 64  }
  0x32   : > { %3297 = dma.hbm_to_vmem [thread:$0]  (!%p3295_p13), %s274_s5, 2048, %s276_s4, %s264_s19, %s4737_s17, %s4737_s17, %s4736_s3  }
  0x33   : > { %287 = sbr.rel (%p3719_p11) target bundleno = 1253 (0x4e5), region = 48  ;;  %s289_s9 = sand.u32 (!%p3719_p11), 1, %s3567_s28  }
  0x34   : > { %s3775_s24 = sshll.u32 (!%p3719_p11), %s289_s9, 7  ;;  %s290_s6 = scalar_lea.sflag (!%p3719_p11), [#allocation4], %s289_s9 }
  0x35   : > { %s293_s8 = scalar_lea.vmem (!%p3719_p11), [#allocation3], %s3775_s24 }
  0x38   : > { %3538 = dma.done.wait (%p3703_p4), %s290_s6, 2048  }
  0x39   : > { %3540 = vsyncadd (%p3703_p4), %s290_s6, 4294965248 }
  0x3a   : > { %3542 = dma.done.wait (%p3695_p1), [#allocation7], 2304  }
  0x3b   : > { %3544 = vsyncadd (%p3695_p1), [#allocation7], 4294964992  ;;  %s327_s4 = sand.u32 1, %s3555_s25   ;;  %s2733_s5 = sshll.u32 %s3575_s30, 3  ;;  %v3116_v0 = vld [vmem:[%s4699_s1 + $0x38] sm:$0xff]  ;;  %v3115_v1 = vld [vmem:[%s4699_s1 + $0x30] sm:$0xff] }
  0x3c   : > { %s3790_s18 = sshll.u32 %s327_s4, 6  ;;  %542 = vmatpush.bf16.msra.mxu0 %v3116_v0  ;;  %3254 = vmatpush.bf16.msra.mxu1 %v3116_v0  ;;  %v3114_v2 = vld [vmem:[%s4699_s1 + $0x28] sm:$0xff]  ;;  %v3113_v3 = vld [vmem:[%s4699_s1 + $0x20] sm:$0xff]  ;;  %v3112_v4 = vld [vmem:[%s4699_s1 + $0x18] sm:$0xff]  ;;  %vm333_vm0 = vcmask 257024   ;;  %vm336_vm1 = vcmask 253952  }
  0x3d   : > { %3255 = vmatpush.bf16.msra.mxu2 %v3116_v0  ;;  %3256 = vmatpush.bf16.msra.mxu3 %v3116_v0  ;;  %v3111_v5 = vld [vmem:[%s4699_s1 + $0x10] sm:$0xff]  ;;  %vm343_vm2 = vsmask.f32 256  ;;  %v3596_v6 = vmov 0   ;;  %v348_v8 = vld [vmem:[#allocation2 + $0xc] sm:$0x1] }
  0x3e   : > { %334 = vst.msk [vmem:[#allocation2] sm:$0xf] %vm333_vm0, %v3596_v6  ;;  %vm3813_vm3 = vmand %vm336_vm1, %vm343_vm2  ;;  %v3110_v9 = vld [vmem:[%s4699_s1 + $0x8] sm:$0xff]  ;;  %s3100_s27 = sshll.u32 %s3575_s30, 6  ;;  %vm375_vm4 = vsmask.f32 7938 }
  0x3f   : > { %335 = vst.msk [vmem:[#allocation2 + $0x4] sm:$0xf] %vm333_vm0, %v3596_v6  ;;  %v349_v10 = vsel %vm3813_vm3, 0, %v348_v8  ;;  %v3109_v11 = vld [vmem:[%s4699_s1] sm:$0xff]  ;;  %s3833_s13 = scalar_lea.vmem %s293_s8, %s3100_s27 [#allocation3]  ;;  %vm3839_vm5 = vmand %vm336_vm1, %vm375_vm4  ;;  %v360_v31 = vld [vmem:[#allocation2 + $0x3c] sm:$0x1] }
  0x40   : > { %543 = vmatpush.bf16.msra.mxu0 %v3115_v1  ;;  %3257 = vmatpush.bf16.msra.mxu1 %v3115_v1  ;;  %337 = vst.msk [vmem:[#allocation2 + $0x8] sm:$0x1] %vm336_vm1, %v3596_v6  ;;  %v3101_v16 = vld [vmem:[%s3833_s13] sm:$0xff]  ;;  %v3103_v17 = vld [vmem:[%s3833_s13 + $0x10] sm:$0xff]  ;;  %v3102_v25 = vld [vmem:[%s3833_s13 + $0x8] sm:$0xff]  ;;  %v361_v33 = vsel %vm3813_vm3, 0, %v360_v31 }
  0x41   : > { %3258 = vmatpush.bf16.msra.mxu2 %v3115_v1  ;;  %3259 = vmatpush.bf16.msra.mxu3 %v3115_v1  ;;  %339 = vst.msk [vmem:[#allocation2 + $0x6c] sm:$0xf] %vm333_vm0, %v3596_v6  ;;  %v3105_v20 = vld [vmem:[%s3833_s13 + $0x20] sm:$0xff]  ;;  %v3107_v21 = vld [vmem:[%s3833_s13 + $0x30] sm:$0xff]  ;;  %v3104_v26 = vld [vmem:[%s3833_s13 + $0x18] sm:$0xff]  ;;  %s4005_s20 = scalar_lea.vmem [#allocation8], %s3790_s18 }
  0x42   : > { %340 = vst.msk [vmem:[#allocation2 + $0x70] sm:$0xf] %vm333_vm0, %v3596_v6  ;;  %v3106_v27 = vld [vmem:[%s3833_s13 + $0x28] sm:$0xff]  ;;  %v3108_v28 = vld [vmem:[%s3833_s13 + $0x38] sm:$0xff]  ;;  %v354_v29 = vld [vmem:[#allocation2 + $0x24] sm:$0x1] }
  0x43   : > { %341 = vst.msk [vmem:[#allocation2 + $0x74] sm:$0x1] %vm336_vm1, %v3596_v6  ;;  %v355_v30 = vsel %vm3813_vm3, 0, %v354_v29  ;;  %v366_v32 = vld [vmem:[#allocation2 + $0x54] sm:$0x1]  ;;  %vm3900_vm6 = vmand %vm333_vm0, %vm375_vm4  ;;  %p2800_p1 = scmp.le.s32.totalorder %s3575_s30, 0 }
  0x44   : > { %544 = vmatpush.bf16.msra.mxu0 %v3114_v2  ;;  %3260 = vmatpush.bf16.msra.mxu1 %v3114_v2  ;;  %350 = vst [vmem:[#allocation2 + $0xc] sm:$0x1] %v349_v10  ;;  %v367_v34 = vsel %vm3813_vm3, 0, %v366_v32  ;;  %v380_v35 = vld [vmem:[#allocation2 + $0x14] sm:$0x1]  ;;  %s2801_s19 = sadd.s32 (!%p2800_p1), 4294967295, %s2733_s5 }
  0x45   : > { %3261 = vmatpush.bf16.msra.mxu2 %v3114_v2  ;;  %3262 = vmatpush.bf16.msra.mxu3 %v3114_v2  ;;  %v345_v12 = vld [vmem:[#allocation2] sm:$0x1]  ;;  %356 = vst [vmem:[#allocation2 + $0x24] sm:$0x1] %v355_v30  ;;  %v381_v36 = vsel %vm3839_vm5, 0, %v380_v35  ;;  %s3117_s23 = sshll.u32 (!%p2800_p1), %s2801_s19, 3 }
  0x46   : > { %v346_v13 = vsel %vm3813_vm3, 0, %v345_v12  ;;  %362 = vst [vmem:[#allocation2 + $0x3c] sm:$0x1] %v361_v33  ;;  %v386_v37 = vld [vmem:[#allocation2 + $0x2c] sm:$0x1]  ;;  %s851_s9 = scalar_lea.vmem (!%p2800_p1), %s293_s8, %s3117_s23 [#allocation3] }
  0x47   : > { %347 = vst [vmem:[#allocation2] sm:$0x1] %v346_v13  ;;  %v377_v15 = vld [vmem:[#allocation2 + $0x8] sm:$0x1]  ;;  %v387_v38 = vsel %vm3839_vm5, 0, %v386_v37 }
  0x48   : > { %545 = vmatpush.bf16.msra.mxu0 %v3113_v3  ;;  %3263 = vmatpush.bf16.msra.mxu1 %v3113_v3  ;;  %v372_v18 = vld [vmem:[#allocation2 + $0x6c] sm:$0x1]  ;;  %v378_v19 = vsel %vm3839_vm5, 0, %v377_v15  ;;  %368 = vst [vmem:[#allocation2 + $0x54] sm:$0x1] %v367_v34 }
  0x49   : > { %3264 = vmatpush.bf16.msra.mxu2 %v3113_v3  ;;  %3265 = vmatpush.bf16.msra.mxu3 %v3113_v3  ;;  %v373_v22 = vsel %vm3813_vm3, 0, %v372_v18  ;;  %379 = vst [vmem:[#allocation2 + $0x8] sm:$0x1] %v378_v19  ;;  %v392_v39 = vld [vmem:[#allocation2 + $0x44] sm:$0x1] }
  0x4a   : > { %374 = vst [vmem:[#allocation2 + $0x6c] sm:$0x1] %v373_v22  ;;  %v404_v23 = vld [vmem:[#allocation2 + $0x74] sm:$0x1]  ;;  %v393_v40 = vsel %vm3839_vm5, 0, %v392_v39 }
  0x4b   : > { %v405_v24 = vsel %vm3839_vm5, 0, %v404_v23  ;;  %382 = vst [vmem:[#allocation2 + $0x14] sm:$0x1] %v381_v36  ;;  %v398_v41 = vld [vmem:[#allocation2 + $0x5c] sm:$0x1] }
  0x4c   : > { %546 = vmatpush.bf16.msra.mxu0 %v3112_v4  ;;  %3266 = vmatpush.bf16.msra.mxu1 %v3112_v4  ;;  %406 = vst [vmem:[#allocation2 + $0x74] sm:$0x1] %v405_v24  ;;  %v399_v42 = vsel %vm3839_vm5, 0, %v398_v41  ;;  %v3874_v43 = vld [vmem:[%s4700_s2] ss:$0 sm:$0xff] }
  0x4d   : > { %3267 = vmatpush.bf16.msra.mxu2 %v3112_v4  ;;  %3268 = vmatpush.bf16.msra.mxu3 %v3112_v4  ;;  %388 = vst [vmem:[#allocation2 + $0x2c] sm:$0x1] %v387_v38  ;;  %v351_v44 = vld [vmem:[#allocation2 + $0x18] sm:$0x1]  ;;  %v357_v45 = vld [vmem:[#allocation2 + $0x30] sm:$0x1] }
  0x4e   : > { %394 = vst [vmem:[#allocation2 + $0x44] sm:$0x1] %v393_v40  ;;  %v352_v46 = vsel %vm3813_vm3, 0, %v351_v44  ;;  %v358_v47 = vsel %vm3813_vm3, 0, %v357_v45  ;;  %v363_v48 = vld [vmem:[#allocation2 + $0x48] sm:$0x1] }
  0x4f   : > { %400 = vst [vmem:[#allocation2 + $0x5c] sm:$0x1] %v399_v42  ;;  %v364_v51 = vsel %vm3813_vm3, 0, %v363_v48  ;;  %v369_v54 = vld [vmem:[#allocation2 + $0x60] sm:$0x1] }
  0x50   : > { %547 = vmatpush.bf16.msra.mxu0 %v3111_v5  ;;  %3269 = vmatpush.bf16.msra.mxu1 %v3111_v5  ;;  %353 = vst [vmem:[#allocation2 + $0x18] sm:$0x1] %v352_v46  ;;  %v383_v55 = vld [vmem:[#allocation2 + $0x20] sm:$0x1]  ;;  %v370_v56 = vsel %vm3813_vm3, 0, %v369_v54 }
  0x51   : > { %3270 = vmatpush.bf16.msra.mxu2 %v3111_v5  ;;  %3271 = vmatpush.bf16.msra.mxu3 %v3111_v5  ;;  %359 = vst [vmem:[#allocation2 + $0x30] sm:$0x1] %v358_v47  ;;  %v384_v57 = vsel %vm3839_vm5, 0, %v383_v55  ;;  %v389_v58 = vld [vmem:[#allocation2 + $0x38] sm:$0x1] }
  0x52   : > { %365 = vst [vmem:[#allocation2 + $0x48] sm:$0x1] %v364_v51  ;;  %v390_v61 = vsel %vm3839_vm5, 0, %v389_v58  ;;  %v788_v12 = vld [vmem:[#allocation2 + $0xc] sm:$0xf] }
  0x53   : > { %371 = vst [vmem:[#allocation2 + $0x60] sm:$0x1] %v370_v56  ;;  %v802_v18 = vld [vmem:[#allocation2 + $0x24] sm:$0xf]  ;;  %vm623_vm7 = vsmask.f32 4368 }
  0x54   : > { %548 = vmatpush.bf16.msra.mxu0 %v3110_v9  ;;  %3272 = vmatpush.bf16.msra.mxu1 %v3110_v9  ;;  %385 = vst [vmem:[#allocation2 + $0x20] sm:$0x1] %v384_v57  ;;  %v401_v24 = vld [vmem:[#allocation2 + $0x68] sm:$0x1]  ;;  %v816_v38 = vld [vmem:[#allocation2 + $0x3c] sm:$0xf]  ;;  %vm3932_vm8 = vmor %vm343_vm2, %vm623_vm7 }
  0x55   : > { %3273 = vmatpush.bf16.msra.mxu2 %v3110_v9  ;;  %3274 = vmatpush.bf16.msra.mxu3 %v3110_v9  ;;  %391 = vst [vmem:[#allocation2 + $0x38] sm:$0x1] %v390_v61  ;;  %v402_v36 = vsel %vm3839_vm5, 0, %v401_v24  ;;  %v830_v47 = vld [vmem:[#allocation2 + $0x54] sm:$0xf] }
  0x56   : > { %403 = vst [vmem:[#allocation2 + $0x68] sm:$0x1] %v402_v36 }
  0x58   : > { %549 = vmatpush.bf16.msra.mxu0 %v3109_v11  ;;  %3275 = vmatpush.bf16.msra.mxu1 %v3109_v11 }
  0x59   : > { %3276 = vmatpush.bf16.msra.mxu2 %v3109_v11  ;;  %3277 = vmatpush.bf16.msra.mxu3 %v3109_v11 }
  0x5b   : > { %550 = vmatmul.bf16.vlgmr.msra.gmra.mxu0 %v3101_v16  ;;  %560 = vmatmul.bf16.vlgmr.msra.gmra.mxu1 %v3103_v17 }
  0x5c   : > { %570 = vmatmul.bf16.vlgmr.msra.gmra.mxu2 %v3105_v20  ;;  %580 = vmatmul.bf16.vlgmr.msra.gmra.mxu3 %v3107_v21  ;;  %v395_v21 = vld [vmem:[#allocation2 + $0x50] sm:$0x1] }
  0x5d   : > { %v396_v32 = vsel %vm3839_vm5, 0, %v395_v21 }
  0x5e   : > { %397 = vst [vmem:[#allocation2 + $0x50] sm:$0x1] %v396_v32 }
  0x6b   : > { %555 = vmatmul.bf16.gmra.mxu0 %v3102_v25  ;;  %565 = vmatmul.bf16.gmra.mxu1 %v3104_v26 }
  0x6c   : > { %575 = vmatmul.bf16.gmra.mxu2 %v3106_v27  ;;  %585 = vmatmul.bf16.gmra.mxu3 %v3108_v28 }
  0xd8   : > { %v551_v49 = vpop.f32.mrf.mxu0  ;;  %v561_v50 = vpop.f32.mrf.mxu1 }
  0xd9   : > { %v552_v52 = vadd.f32 %v3874_v43, %v551_v49  ;;  %v562_v53 = vadd.f32 %v3874_v43, %v561_v50 }
  0xdb   : > { %v591_v59 = vmax.f32 %v552_v52, 0.0  ;;  %v595_v60 = vmax.f32 %v562_v53, 0.0 }
  0xdd   : > { %v607_v62 = vpack.c.bf16 %v591_v59, %v591_v59  ;;  %v611_v63 = vpack.c.bf16 %v595_v60, %v595_v60 }
  0xdf   : > { %v626_v0 = vshrl.u32 %v607_v62, 16  ;;  %v629_v1 = vshll.u32 %v607_v62, 16  ;;  %v660_v2 = vshrl.u32 %v611_v63, 16  ;;  %v663_v3 = vshll.u32 %v611_v63, 16  ;;  %v571_v4 = vpop.f32.mrf.mxu2  ;;  %v581_v5 = vpop.f32.mrf.mxu3 }
  0xe0   : > { %v572_v6 = vadd.f32 %v3874_v43, %v571_v4  ;;  %v582_v8 = vadd.f32 %v3874_v43, %v581_v5  ;;  %v553_v9 = vpop.f32.mrf.mxu0  ;;  %v563_v10 = vpop.f32.mrf.mxu1 }
  0xe1   : > { %v3892_v11 = vrot.slane %v626_v0, 7  ;;  %v3894_v13 = vrot.slane %v660_v2, 7  ;;  %v554_v15 = vadd.f32 %v3874_v43, %v553_v9  ;;  %v564_v16 = vadd.f32 %v3874_v43, %v563_v10  ;;  %v792_v2 = vld [vmem:[#allocation2 + $0x14] sm:$0x1] }
  0xe2   : > { %v599_v19 = vmax.f32 %v572_v6, 0.0  ;;  %v603_v20 = vmax.f32 %v582_v8, 0.0 }
  0xe3   : > { %v631_v22 = vor.u32 %v629_v1, %v3892_v11  ;;  %v665_v23 = vor.u32 %v663_v3, %v3894_v13  ;;  %v592_v27 = vmax.f32 %v554_v15, 0.0  ;;  %v596_v28 = vmax.f32 %v564_v16, 0.0  ;;  %v806_v3 = vld [vmem:[#allocation2 + $0x2c] sm:$0x1] }
  0xe4   : > { %v615_v25 = vpack.c.bf16 %v599_v19, %v599_v19  ;;  %v619_v26 = vpack.c.bf16 %v603_v20, %v603_v20  ;;  %v632_v29 = vrot.slane %v3892_v11, 4  ;;  %v666_v33 = vrot.slane %v3894_v13, 4 }
  0xe5   : > { %v789_v30 = vsel %vm3900_vm6, %v631_v22, %v788_v12  ;;  %v803_v31 = vsel %vm3900_vm6, %v665_v23, %v802_v18  ;;  %v608_v40 = vpack.c.bf16 %v592_v27, %v592_v27  ;;  %v612_v41 = vpack.c.bf16 %v596_v28, %v596_v28 }
  0xe6   : > { %790 = vst [vmem:[#allocation2 + $0xc] sm:$0xf] %v789_v30  ;;  %v694_v34 = vshrl.u32 %v615_v25, 16  ;;  %v728_v35 = vshrl.u32 %v619_v26, 16  ;;  %v697_v37 = vshll.u32 %v615_v25, 16  ;;  %v731_v39 = vshll.u32 %v619_v26, 16 }
  0xe7   : > { %804 = vst [vmem:[#allocation2 + $0x24] sm:$0xf] %v803_v31  ;;  %v573_v42 = vpop.f32.mrf.mxu2  ;;  %v583_v44 = vpop.f32.mrf.mxu3  ;;  %v634_v51 = vshrl.u32 %v608_v40, 16  ;;  %v637_v52 = vshll.u32 %v608_v40, 16  ;;  %v668_v53 = vshrl.u32 %v612_v41, 16  ;;  %v671_v54 = vshll.u32 %v612_v41, 16 }
  0xe8   : > { %v3916_v45 = vrot.slane %v694_v34, 7  ;;  %v3918_v46 = vrot.slane %v728_v35, 7  ;;  %v574_v48 = vadd.f32 %v3874_v43, %v573_v42  ;;  %v584_v49 = vadd.f32 %v3874_v43, %v583_v44  ;;  %v556_v50 = vpop.f32.mrf.mxu0  ;;  %v566_v14 = vpop.f32.mrf.mxu1  ;;  %v820_v34 = vld [vmem:[#allocation2 + $0x44] sm:$0x1] }
  0xe9   : > { %v636_v59 = vrot.slane %v634_v51, 7  ;;  %v670_v60 = vrot.slane %v668_v53, 7  ;;  %v557_v4 = vadd.f32 %v3874_v43, %v556_v50  ;;  %v567_v5 = vadd.f32 %v3874_v43, %v566_v14 }
  0xea   : > { %v699_v55 = vor.u32 %v697_v37, %v3916_v45  ;;  %v700_v56 = vrot.slane %v3916_v45, 4  ;;  %v733_v57 = vor.u32 %v731_v39, %v3918_v46  ;;  %v734_v58 = vrot.slane %v3918_v46, 4 }
  0xeb   : > { %v600_v61 = vmax.f32 %v574_v48, 0.0  ;;  %v604_v62 = vmax.f32 %v584_v49, 0.0  ;;  %v639_v6 = vor.u32 %v637_v52, %v636_v59  ;;  %v641_v8 = vrot.slane %v636_v59, 4  ;;  %v834_v49 = vld [vmem:[#allocation2 + $0x5c] sm:$0x1] }
  0xec   : > { %v817_v63 = vsel %vm3900_vm6, %v699_v55, %v816_v38  ;;  %v831_v0 = vsel %vm3900_vm6, %v733_v57, %v830_v47  ;;  %v673_v9 = vor.u32 %v671_v54, %v670_v60  ;;  %v675_v10 = vrot.slane %v670_v60, 4  ;;  %v795_v57 = vld [vmem:[#allocation2 + $0x18] sm:$0xf]  ;;  %v809_v59 = vld [vmem:[#allocation2 + $0x30] sm:$0xf] }
  0xed   : > { %818 = vst [vmem:[#allocation2 + $0x3c] sm:$0xf] %v817_v63  ;;  %v616_v11 = vpack.c.bf16 %v600_v61, %v600_v61  ;;  %v620_v12 = vpack.c.bf16 %v604_v62, %v604_v62  ;;  %v593_v13 = vmax.f32 %v557_v4, 0.0  ;;  %v597_v15 = vmax.f32 %v567_v5, 0.0 }
  0xee   : > { %832 = vst [vmem:[#allocation2 + $0x54] sm:$0xf] %v831_v0  ;;  %v640_v16 = vsel %vm3932_vm8, %v632_v29, %v639_v6  ;;  %v793_v18 = vsel %vm3813_vm3, %v641_v8, %v792_v2  ;;  %v674_v19 = vsel %vm3932_vm8, %v666_v33, %v673_v9  ;;  %v807_v20 = vsel %vm3813_vm3, %v675_v10, %v806_v3 }
  0xef   : > { %v576_v21 = vpop.f32.mrf.mxu2  ;;  %v586_v22 = vpop.f32.mrf.mxu3  ;;  %791 = vst.msk [vmem:[#allocation2 + $0x10] sm:$0xf] %vm333_vm0, %v640_v16  ;;  %v702_v23 = vshrl.u32 %v616_v11, 16  ;;  %v705_v24 = vshll.u32 %v616_v11, 16  ;;  %v736_v25 = vshrl.u32 %v620_v12, 16  ;;  %v739_v26 = vshll.u32 %v620_v12, 16 }
  0xf0   : > { %v558_v27 = vpop.f32.mrf.mxu0  ;;  %v568_v28 = vpop.f32.mrf.mxu1  ;;  %794 = vst [vmem:[#allocation2 + $0x14] sm:$0x1] %v793_v18  ;;  %v609_v29 = vpack.c.bf16 %v593_v13, %v593_v13  ;;  %v613_v30 = vpack.c.bf16 %v597_v15, %v597_v15  ;;  %v577_v31 = vadd.f32 %v3874_v43, %v576_v21  ;;  %v587_v32 = vadd.f32 %v3874_v43, %v586_v22 }
  0xf1   : > { %805 = vst.msk [vmem:[#allocation2 + $0x28] sm:$0xf] %vm333_vm0, %v674_v19  ;;  %v704_v33 = vrot.slane %v702_v23, 7  ;;  %v738_v35 = vrot.slane %v736_v25, 7  ;;  %v559_v36 = vadd.f32 %v3874_v43, %v558_v27  ;;  %v569_v37 = vadd.f32 %v3874_v43, %v568_v28  ;;  %v823_v19 = vld [vmem:[#allocation2 + $0x48] sm:$0xf] }
  0xf2   : > { %808 = vst [vmem:[#allocation2 + $0x2c] sm:$0x1] %v807_v20  ;;  %v643_v38 = vshrl.u32 %v609_v29, 16  ;;  %v646_v39 = vshll.u32 %v609_v29, 16  ;;  %v677_v40 = vshrl.u32 %v613_v30, 16  ;;  %v680_v41 = vshll.u32 %v613_v30, 16 }
  0xf3   : > { %v707_v42 = vor.u32 %v705_v24, %v704_v33  ;;  %v709_v44 = vrot.slane %v704_v33, 4  ;;  %v741_v47 = vor.u32 %v739_v26, %v738_v35  ;;  %v743_v48 = vrot.slane %v738_v35, 4  ;;  %v837_v20 = vld [vmem:[#allocation2 + $0x60] sm:$0xf] }
  0xf4   : > { %v3952_v50 = vrot.slane %v643_v38, 7  ;;  %v3954_v14 = vrot.slane %v677_v40, 7  ;;  %v601_v51 = vmax.f32 %v577_v31, 0.0  ;;  %v605_v52 = vmax.f32 %v587_v32, 0.0 }
  0xf5   : > { %v708_v53 = vsel %vm3932_vm8, %v700_v56, %v707_v42  ;;  %v821_v54 = vsel %vm3813_vm3, %v709_v44, %v820_v34  ;;  %v742_v55 = vsel %vm3932_vm8, %v734_v58, %v741_v47  ;;  %v835_v60 = vsel %vm3813_vm3, %v743_v48, %v834_v49  ;;  %v799_v34 = vld [vmem:[#allocation2 + $0x20] sm:$0x1] }
  0xf6   : > { %819 = vst.msk [vmem:[#allocation2 + $0x40] sm:$0xf] %vm333_vm0, %v708_v53  ;;  %v648_v45 = vor.u32 %v646_v39, %v3952_v50  ;;  %v682_v61 = vor.u32 %v680_v41, %v3954_v14  ;;  %v617_v63 = vpack.c.bf16 %v601_v51, %v601_v51  ;;  %v621_v0 = vpack.c.bf16 %v605_v52, %v605_v52  ;;  %v813_v39 = vld [vmem:[#allocation2 + $0x38] sm:$0x1] }
  0xf7   : > { %v578_v56 = vpop.f32.mrf.mxu2  ;;  %v588_v62 = vpop.f32.mrf.mxu3  ;;  %822 = vst [vmem:[#allocation2 + $0x44] sm:$0x1] %v821_v54  ;;  %v594_v46 = vmax.f32 %v559_v36, 0.0  ;;  %v598_v2 = vmax.f32 %v569_v37, 0.0  ;;  %v649_v30 = vrot.slane %v3952_v50, 4  ;;  %v683_v31 = vrot.slane %v3954_v14, 4 }
  0xf8   : > { %833 = vst.msk [vmem:[#allocation2 + $0x58] sm:$0xf] %vm333_vm0, %v742_v55  ;;  %v796_v58 = vsel %vm3900_vm6, %v648_v45, %v795_v57  ;;  %v810_v3 = vsel %vm3900_vm6, %v682_v61, %v809_v59  ;;  %v579_v4 = vadd.f32 %v3874_v43, %v578_v56  ;;  %v589_v5 = vadd.f32 %v3874_v43, %v588_v62  ;;  %v827_v54 = vld [vmem:[#allocation2 + $0x50] sm:$0x1]  ;;  %v841_v45 = vld [vmem:[#allocation2 + $0x68] sm:$0x1] }
  0xf9   : > { %836 = vst [vmem:[#allocation2 + $0x5c] sm:$0x1] %v835_v60  ;;  %v711_v6 = vshrl.u32 %v617_v63, 16  ;;  %v745_v8 = vshrl.u32 %v621_v0, 16  ;;  %v610_v9 = vpack.c.bf16 %v594_v46, %v594_v46  ;;  %v614_v10 = vpack.c.bf16 %v598_v2, %v598_v2 }
  0xfa   : > { %797 = vst [vmem:[#allocation2 + $0x18] sm:$0xf] %v796_v58  ;;  %v602_v11 = vmax.f32 %v579_v4, 0.0  ;;  %v606_v12 = vmax.f32 %v589_v5, 0.0  ;;  %v714_v15 = vshll.u32 %v617_v63, 16  ;;  %v748_v18 = vshll.u32 %v621_v0, 16 }
  0xfb   : > { %811 = vst [vmem:[#allocation2 + $0x30] sm:$0xf] %v810_v3  ;;  %v713_v13 = vrot.slane %v711_v6, 7  ;;  %v747_v16 = vrot.slane %v745_v8, 7  ;;  %v651_v21 = vshrl.u32 %v610_v9, 16  ;;  %v685_v22 = vshrl.u32 %v614_v10, 16 }
  0xfc   : > { %v654_v43 = vshll.u32 %v610_v9, 16  ;;  %v688_v25 = vshll.u32 %v614_v10, 16  ;;  %v618_v28 = vpack.c.bf16 %v602_v11, %v602_v11  ;;  %v622_v29 = vpack.c.bf16 %v606_v12, %v606_v12 }
  0xfd   : > { %v716_v23 = vor.u32 %v714_v15, %v713_v13  ;;  %v750_v24 = vor.u32 %v748_v18, %v747_v16  ;;  %v653_v26 = vrot.slane %v651_v21, 7  ;;  %v687_v27 = vrot.slane %v685_v22, 7 }
  0xfe   : > { %v719_v40 = vshrl.u32 %v618_v28, 16  ;;  %v753_v41 = vshrl.u32 %v622_v29, 16  ;;  %v722_v48 = vshll.u32 %v618_v28, 16  ;;  %v756_v51 = vshll.u32 %v622_v29, 16 }
  0xff   : > { %v824_v32 = vsel %vm3900_vm6, %v716_v23, %v823_v19  ;;  %v838_v33 = vsel %vm3900_vm6, %v750_v24, %v837_v20  ;;  %v656_v35 = vor.u32 %v654_v43, %v653_v26  ;;  %v658_v36 = vrot.slane %v653_v26, 4 }
 0x100   : > { %825 = vst [vmem:[#allocation2 + $0x48] sm:$0xf] %v824_v32  ;;  %v690_v37 = vor.u32 %v688_v25, %v687_v27  ;;  %v692_v38 = vrot.slane %v687_v27, 4  ;;  %v721_v50 = vrot.slane %v719_v40, 7  ;;  %v755_v14 = vrot.slane %v753_v41, 7 }
 0x101   : > { %839 = vst [vmem:[#allocation2 + $0x60] sm:$0xf] %v838_v33  ;;  %v657_v42 = vsel %vm3932_vm8, %v649_v30, %v656_v35  ;;  %v800_v44 = vsel %vm3813_vm3, %v658_v36, %v799_v34  ;;  %v717_v52 = vrot.slane %v713_v13, 4  ;;  %v751_v53 = vrot.slane %v747_v16, 4 }
 0x102   : > { %v691_v47 = vsel %vm3932_vm8, %v683_v31, %v690_v37  ;;  %798 = vst.msk [vmem:[#allocation2 + $0x1c] sm:$0xf] %vm333_vm0, %v657_v42  ;;  %v814_v49 = vsel %vm3813_vm3, %v692_v38, %v813_v39  ;;  %v724_v55 = vor.u32 %v722_v48, %v721_v50  ;;  %v726_v57 = vrot.slane %v721_v50, 4 }
 0x103   : > { %801 = vst [vmem:[#allocation2 + $0x20] sm:$0x1] %v800_v44  ;;  %v758_v59 = vor.u32 %v756_v51, %v755_v14  ;;  %v760_v60 = vrot.slane %v755_v14, 4 }
 0x104   : > { %812 = vst.msk [vmem:[#allocation2 + $0x34] sm:$0xf] %vm333_vm0, %v691_v47  ;;  %v725_v61 = vsel %vm3932_vm8, %v717_v52, %v724_v55  ;;  %v828_v56 = vsel %vm3813_vm3, %v726_v57, %v827_v54 }
 0x105   : > { %815 = vst [vmem:[#allocation2 + $0x38] sm:$0x1] %v814_v49  ;;  %v759_v62 = vsel %vm3932_vm8, %v751_v53, %v758_v59  ;;  %v842_v63 = vsel %vm3813_vm3, %v760_v60, %v841_v45  ;;  %847 = sbr.rel (%p2800_p1) target bundleno = 447 (0x1bf), region = 60 }
 0x106   : > { %826 = vst.msk [vmem:[#allocation2 + $0x4c] sm:$0xf] %vm333_vm0, %v725_v61 }
 0x107   : > { %829 = vst [vmem:[#allocation2 + $0x50] sm:$0x1] %v828_v56 }
 0x108   : > { %840 = vst.msk [vmem:[#allocation2 + $0x64] sm:$0xf] %vm333_vm0, %v759_v62 }
 0x109   : > { %843 = vst [vmem:[#allocation2 + $0x68] sm:$0x1] %v842_v63 }
 0x10a   : > { %v3126_v0 = vld [vmem:[%s4699_s1 + $0x38] sm:$0xff]  ;;  %v3125_v46 = vld [vmem:[%s4699_s1 + $0x30] sm:$0xff]  ;;  %v3124_v2 = vld [vmem:[%s4699_s1 + $0x28] sm:$0xff] }
 0x10b   : > { %928 = vmatpush.bf16.msra.mxu0 %v3126_v0  ;;  %v3123_v58 = vld [vmem:[%s4699_s1 + $0x20] sm:$0xff]  ;;  %v3122_v3 = vld [vmem:[%s4699_s1 + $0x18] sm:$0xff]  ;;  %v3121_v4 = vld [vmem:[%s4699_s1 + $0x10] sm:$0xff] }
 0x10c   : > { %v3120_v5 = vld [vmem:[%s4699_s1 + $0x8] sm:$0xff]  ;;  %v3119_v6 = vld [vmem:[%s4699_s1] sm:$0xff] }
 0x10d   : > { %v3118_v8 = vld [vmem:[%s851_s9] sm:$0xff]  ;;  %v970_v28 = vld [vmem:[#allocation2 + $0x8] sm:$0x1] }
 0x10e   : > { %v3401_v9 = vld [vmem:[%s4700_s2] ss:$0 sm:$0xff] }
 0x10f   : > { %929 = vmatpush.bf16.msra.mxu0 %v3125_v46  ;;  %v966_v21 = vld [vmem:[#allocation2] sm:$0xf] }
 0x113   : > { %930 = vmatpush.bf16.msra.mxu0 %v3124_v2 }
 0x117   : > { %931 = vmatpush.bf16.msra.mxu0 %v3123_v58 }
 0x11b   : > { %932 = vmatpush.bf16.msra.mxu0 %v3122_v3 }
 0x11f   : > { %933 = vmatpush.bf16.msra.mxu0 %v3121_v4 }
 0x123   : > { %934 = vmatpush.bf16.msra.mxu0 %v3120_v5 }
 0x127   : > { %935 = vmatpush.bf16.msra.mxu0 %v3119_v6 }
 0x12a   : > { %936 = vmatmul.bf16.vlgmr.msra.gmra.mxu0 %v3118_v8 }
 0x1a7   : > { %v937_v10 = vpop.f32.mrf.mxu0 }
 0x1a8   : > { %v938_v11 = vadd.f32 %v3401_v9, %v937_v10 }
 0x1aa   : > { %v942_v12 = vmax.f32 %v938_v11, 0.0 }
 0x1ac   : > { %v944_v13 = vpack.c.bf16 %v942_v12, %v942_v12 }
 0x1ae   : > { %v947_v15 = vshrl.u32 %v944_v13, 16  ;;  %v950_v19 = vshll.u32 %v944_v13, 16 }
 0x1af   : > { %v939_v16 = vpop.f32.mrf.mxu0 }
 0x1b0   : > { %v949_v18 = vrot.slane %v947_v15, 7  ;;  %v940_v20 = vadd.f32 %v3401_v9, %v939_v16 }
 0x1b2   : > { %v952_v22 = vor.u32 %v950_v19, %v949_v18  ;;  %v943_v23 = vmax.f32 %v940_v20, 0.0  ;;  %v953_v29 = vrot.slane %v949_v18, 4 }
 0x1b4   : > { %v967_v24 = vsel %vm3900_vm6, %v952_v22, %v966_v21  ;;  %v945_v43 = vpack.c.bf16 %v943_v23, %v943_v23 }
 0x1b5   : > { %968 = vst [vmem:[#allocation2] sm:$0xf] %v967_v24 }
 0x1b6   : > { %v955_v25 = vshrl.u32 %v945_v43, 16  ;;  %v958_v27 = vshll.u32 %v945_v43, 16 }
 0x1b8   : > { %v957_v26 = vrot.slane %v955_v25, 7 }
 0x1ba   : > { %v960_v30 = vor.u32 %v958_v27, %v957_v26  ;;  %v962_v31 = vrot.slane %v957_v26, 4 }
 0x1bc   : > { %v961_v32 = vsel %vm3932_vm8, %v953_v29, %v960_v30  ;;  %v971_v33 = vsel %vm3813_vm3, %v962_v31, %v970_v28 }
 0x1bd   : > { %969 = vst.msk [vmem:[#allocation2 + $0x4] sm:$0xf] %vm333_vm0, %v961_v32 }
 0x1be   : > { %972 = vst [vmem:[#allocation2 + $0x8] sm:$0x1] %v971_v33 }
 0x1bf PF: > { %p2840_p4 = scmp.ge.s32.totalorder %s3575_s30, 1 }
 0x1c1   : > { %976 = sbr.rel (%p2840_p4) target bundleno = 635 (0x27b), region = 64 }
 0x1c6   : > { %v3136_v34 = vld [vmem:[%s4699_s1 + $0x38] sm:$0xff]  ;;  %v3135_v35 = vld [vmem:[%s4699_s1 + $0x30] sm:$0xff]  ;;  %v3134_v36 = vld [vmem:[%s4699_s1 + $0x28] sm:$0xff] }
 0x1c7   : > { %1057 = vmatpush.bf16.msra.mxu0 %v3136_v34  ;;  %v3133_v37 = vld [vmem:[%s4699_s1 + $0x20] sm:$0xff]  ;;  %v3132_v38 = vld [vmem:[%s4699_s1 + $0x18] sm:$0xff]  ;;  %v3131_v39 = vld [vmem:[%s4699_s1 + $0x10] sm:$0xff] }
 0x1c8   : > { %v3130_v40 = vld [vmem:[%s4699_s1 + $0x8] sm:$0xff]  ;;  %v3129_v41 = vld [vmem:[%s4699_s1] sm:$0xff]  ;;  %v1099_v63 = vld [vmem:[#allocation2 + $0x74] sm:$0x1] }
 0x1c9   : > { %v3128_v42 = vld [vmem:[%s3833_s13 + $0x40] sm:$0xff]  ;;  %v1095_v55 = vld [vmem:[#allocation2 + $0x6c] sm:$0xf] }
 0x1ca   : > { %v3402_v44 = vld [vmem:[%s4700_s2] ss:$0 sm:$0xff] }
 0x1cb   : > { %1058 = vmatpush.bf16.msra.mxu0 %v3135_v35 }
 0x1cf   : > { %1059 = vmatpush.bf16.msra.mxu0 %v3134_v36 }
 0x1d3   : > { %1060 = vmatpush.bf16.msra.mxu0 %v3133_v37 }
 0x1d7   : > { %1061 = vmatpush.bf16.msra.mxu0 %v3132_v38 }
 0x1db   : > { %1062 = vmatpush.bf16.msra.mxu0 %v3131_v39 }
 0x1df   : > { %1063 = vmatpush.bf16.msra.mxu0 %v3130_v40 }
 0x1e3   : > { %1064 = vmatpush.bf16.msra.mxu0 %v3129_v41 }
 0x1e6   : > { %1065 = vmatmul.bf16.vlgmr.msra.gmra.mxu0 %v3128_v42 }
 0x263   : > { %v1066_v47 = vpop.f32.mrf.mxu0 }
 0x264   : > { %v1067_v48 = vadd.f32 %v3402_v44, %v1066_v47 }
 0x266   : > { %v1071_v49 = vmax.f32 %v1067_v48, 0.0 }
 0x268   : > { %v1073_v50 = vpack.c.bf16 %v1071_v49, %v1071_v49 }
 0x26a   : > { %v1076_v14 = vshrl.u32 %v1073_v50, 16  ;;  %v1079_v53 = vshll.u32 %v1073_v50, 16 }
 0x26b   : > { %v1068_v51 = vpop.f32.mrf.mxu0 }
 0x26c   : > { %v1078_v52 = vrot.slane %v1076_v14, 7  ;;  %v1069_v54 = vadd.f32 %v3402_v44, %v1068_v51 }
 0x26e   : > { %v1081_v57 = vor.u32 %v1079_v53, %v1078_v52  ;;  %v1072_v59 = vmax.f32 %v1069_v54, 0.0  ;;  %v1082_v0 = vrot.slane %v1078_v52, 4 }
 0x270   : > { %v1096_v60 = vsel %vm3900_vm6, %v1081_v57, %v1095_v55  ;;  %v1074_v45 = vpack.c.bf16 %v1072_v59, %v1072_v59 }
 0x271   : > { %1097 = vst [vmem:[#allocation2 + $0x6c] sm:$0xf] %v1096_v60 }
 0x272   : > { %v1084_v61 = vshrl.u32 %v1074_v45, 16  ;;  %v1087_v62 = vshll.u32 %v1074_v45, 16 }
 0x274   : > { %v1086_v56 = vrot.slane %v1084_v61, 7 }
 0x276   : > { %v1089_v46 = vor.u32 %v1087_v62, %v1086_v56  ;;  %v1091_v2 = vrot.slane %v1086_v56, 4 }
 0x278   : > { %v1090_v58 = vsel %vm3932_vm8, %v1082_v0, %v1089_v46  ;;  %v1100_v3 = vsel %vm3813_vm3, %v1091_v2, %v1099_v63 }
 0x279   : > { %1098 = vst.msk [vmem:[#allocation2 + $0x70] sm:$0xf] %vm333_vm0, %v1090_v58 }
 0x27a   : > { %1101 = vst [vmem:[#allocation2 + $0x74] sm:$0x1] %v1100_v3 }
 0x27b PF: > { %v3148_v17 = vld [vmem:[#allocation6 + $0x8] sm:$0xff]  ;;  %v3150_v4 = vld [vmem:[#allocation6 + $0x18] sm:$0xff]  ;;  %vm1136_vm9 = vsmask.f32 3328  ;;  %v3147_v5 = vld [vmem:[#allocation6] sm:$0xff]  ;;  %vm1372_vm11 = vcmask 261120  }
 0x27c   : > { %v3149_v6 = vld [vmem:[#allocation6 + $0x10] sm:$0xff]  ;;  %v4082_v8 = vld [vmem:[#allocation2 + $0x30] sm:$0xf]  ;;  %vm1137_vm10 = vsmask.f32 7440  ;;  %3280 = vmatpush.bf16.msra.mxu3 %v3148_v17  ;;  %3278 = vmatpush.bf16.msra.mxu2 %v3150_v4  ;;  %v3152_v15 = vld [vmem:[#allocation6 + $0x28] sm:$0xff] }
 0x27d   : > { %v4084_v9 = vld [vmem:[#allocation2 + $0x34] sm:$0xf]  ;;  %v4086_v1 = vld [vmem:[#allocation2 + $0x38] sm:$0x1]  ;;  %v1236_v7 = vshrl.u32 %v4082_v8, 16  ;;  %v1239_v10 = vshll.u32 %v4082_v8, 16  ;;  %1403 = vmatpush.bf16.msra.mxu0 %v3150_v4  ;;  %1528 = vmatpush.bf16.msra.mxu1 %v3148_v17  ;;  %vm4107_vm12 = vmor %vm1136_vm9, %vm1137_vm10 }
 0x27e   : > { %v1245_v11 = vshll.u32 %v4084_v9, 16  ;;  %v1249_v12 = vshrl.u32 %v4084_v9, 16  ;;  %v1255_v13 = vshll.u32 %v4086_v1, 16  ;;  %v4093_v16 = vld [vmem:[#allocation2] sm:$0xf]  ;;  %v4099_v22 = vld [vmem:[#allocation2 + $0x30] sm:$0xff] }
 0x27f   : > { %v1238_v18 = vrot.slane %v1236_v7, 4  ;;  %v1241_v19 = vrot.slane %v1239_v10, 5  ;;  %v4095_v20 = vld [vmem:[#allocation2 + $0x4] sm:$0xf]  ;;  %v4097_v21 = vld [vmem:[#allocation2 + $0x8] sm:$0x1] }
 0x280   : > { %v1247_v23 = vrot.slane %v1245_v11, 5  ;;  %v1251_v24 = vrot.slane %v1249_v12, 4  ;;  %v1140_v43 = vshrl.u32 %v4093_v16, 16  ;;  %v3154_v25 = vld [vmem:[#allocation6 + $0x38] sm:$0xff]  ;;  %3281 = vmatpush.bf16.msra.mxu3 %v3147_v5  ;;  %3279 = vmatpush.bf16.msra.mxu2 %v3149_v6  ;;  %v1143_v27 = vshll.u32 %v4093_v16, 16  ;;  %v3137_v30 = vld [vmem:[#allocation2] sm:$0xff] }
 0x281   : > { %v1242_v26 = vor.u32 %v1241_v19, %v1238_v18  ;;  %v1149_v28 = vshll.u32 %v4095_v20, 16  ;;  %v1153_v29 = vshrl.u32 %v4095_v20, 16  ;;  %v3156_v31 = vld [vmem:[#allocation6 + $0x48] sm:$0xff]  ;;  %1404 = vmatpush.bf16.msra.mxu0 %v3149_v6  ;;  %1529 = vmatpush.bf16.msra.mxu1 %v3147_v5  ;;  %v1257_v34 = vrot.slane %v1255_v13, 5  ;;  %v4112_v37 = vld [vmem:[#allocation2 + $0x3c] sm:$0xf] }
 0x282   : > { %v1252_v33 = vor.u32 %v1251_v24, %v1247_v23  ;;  %v1142_v35 = vrot.slane %v1140_v43, 4  ;;  %v1159_v36 = vshll.u32 %v4097_v21, 16  ;;  %v1145_v39 = vrot.slane %v1143_v27, 5  ;;  %v4114_v42 = vld [vmem:[#allocation2 + $0x40] sm:$0xf]  ;;  %s4750_s12 = sld [smem:[#allocation21_spill]] }
 0x283   : > { %v1243_v38 = vrot.slane %v1242_v26, 4  ;;  %v1151_v40 = vrot.slane %v1149_v28, 5  ;;  %v1155_v41 = vrot.slane %v1153_v29, 4  ;;  %2941 = vmatmul.msk.bf16.vlgmr.msra.gmra.mxu3 %vm1372_vm11, %v4099_v22  ;;  %v1260_v48 = vshrl.u32 %v4112_v37, 16  ;;  %v4123_v52 = vld [vmem:[#allocation2 + $0x44] sm:$0x1] }
 0x284   : > { %1709 = vmatpush.bf16.msrb.mxu2 %v3152_v15  ;;  %1799 = vmatpush.bf16.msrb.mxu3 %v3154_v25  ;;  %v1253_v44 = vrot.slane %v1252_v33, 4  ;;  %v1161_v47 = vrot.slane %v1159_v36, 5  ;;  %v1263_v49 = vshll.u32 %v4112_v37, 16  ;;  %v1146_v14 = vor.u32 %v1145_v39, %v1142_v35  ;;  %v4126_v54 = vld [vmem:[#allocation2 + $0xc] sm:$0xf]  ;;  %v3155_v36 = vld [vmem:[#allocation6 + $0x40] sm:$0xff] }
 0x285   : > { %1911 = vmatpush.bf16.msrb.mxu0 %v3156_v31  ;;  %v1248_v50 = vsel %vm4107_vm12, %v1243_v38, %v1247_v23  ;;  %v1156_v51 = vor.u32 %v1155_v41, %v1151_v40  ;;  %2937 = vmatmul.msk.bf16.vlgmr.msra.gmra.mxu1 %vm1372_vm11, %v3137_v30  ;;  %v1269_v53 = vshll.u32 %v4114_v42, 16  ;;  %v1262_v59 = vrot.slane %v1260_v48, 4  ;;  %v4132_v2 = vld [vmem:[#allocation2 + $0x10] sm:$0xf]  ;;  %v4141_v5 = vld [vmem:[#allocation2 + $0x14] sm:$0x1] }
 0x286   : > { %v1258_v55 = vsel %vm4107_vm12, %v1253_v44, %v1257_v34  ;;  %v1344_v57 = vunpack.c.l.b16 %v1248_v50  ;;  %v1265_v60 = vrot.slane %v1263_v49, 5  ;;  %v1147_v61 = vrot.slane %v1146_v14, 4  ;;  %v4144_v12 = vld [vmem:[#allocation2 + $0x48] sm:$0xf]  ;;  %v3151_v23 = vld [vmem:[#allocation6 + $0x20] sm:$0xff]  ;;  %s4751_s21 = sld [smem:[#allocation20_spill]] }
 0x287   : > { %v1345_v45 = vunpack.c.l.b16 %v1258_v55  ;;  %v1157_v56 = vrot.slane %v1156_v51, 4  ;;  %v1271_v62 = vrot.slane %v1269_v53, 5  ;;  %v1273_v0 = vshrl.u32 %v4114_v42, 16  ;;  %v4150_v27 = vld [vmem:[#allocation2 + $0x4c] sm:$0xf]  ;;  %v4159_v44 = vld [vmem:[#allocation2 + $0x3c] sm:$0xff] }
 0x288   : > { %v1266_v63 = vor.u32 %v1265_v60, %v1262_v59  ;;  %v1279_v46 = vshll.u32 %v4123_v52, 16  ;;  %v1164_v58 = vshrl.u32 %v4126_v54, 16  ;;  %v1152_v17 = vsel %vm4107_vm12, %v1147_v61, %v1151_v40  ;;  %1710 = vmatpush.bf16.msrb.mxu2 %v3151_v23  ;;  %v3153_v35 = vld [vmem:[#allocation6 + $0x30] sm:$0xff]  ;;  %v4164_v14 = vld [vmem:[#allocation2 + $0x18] sm:$0xf]  ;;  %s4752_s17 = sld [smem:[#allocation22_spill]] }
 0x289   : > { %v4135_v3 = vpack.c.b16 %v1345_v45, %v1344_v57  ;;  %v1162_v4 = vsel %vm4107_vm12, %v1157_v56, %v1161_v47  ;;  %v1167_v6 = vshll.u32 %v4126_v54, 16  ;;  %v1336_v7 = vunpack.c.l.b16 %v1152_v17  ;;  %1800 = vmatpush.bf16.msrb.mxu3 %v3153_v35  ;;  %1912 = vmatpush.bf16.msrb.mxu0 %v3155_v36  ;;  %v4168_v53 = vld [vmem:[#allocation2 + $0xc] sm:$0xff]  ;;  %v4170_v57 = vld [vmem:[#allocation2 + $0x1c] sm:$0xf]  ;;  %v4196_v35 = vld [vmem:[#allocation2 + $0x58] sm:$0xf] }
 0x28a   : > { %v1337_v10 = vunpack.c.l.b16 %v1162_v4  ;;  %v1275_v11 = vrot.slane %v1273_v0, 4  ;;  %v1267_v13 = vrot.slane %v1266_v63, 4  ;;  %v1166_v15 = vrot.slane %v1164_v58, 4  ;;  %v4172_v60 = vld [vmem:[#allocation2 + $0x50] sm:$0x1]  ;;  %s4753_s9 = sld [smem:[#allocation13_spill]] }
 0x28b   : > { %2893 = vmatmul.msk.bf16.vlgmr.msra.gmra.mxu2 %vm1372_vm11, %v4135_v3  ;;  %v1169_v18 = vrot.slane %v1167_v6, 5  ;;  %v1173_v19 = vshll.u32 %v4132_v2, 16  ;;  %v1281_v25 = vrot.slane %v1279_v46, 5  ;;  %v1177_v26 = vshrl.u32 %v4132_v2, 16  ;;  %s3167_s18 = sshll.u32 %s3575_s30, 4  ;;  %s4754_s15 = sld [smem:[#allocation23_spill]] }
 0x28c   : > { %v1352_v24 = vpack.c.b16 %v1337_v10, %v1336_v7  ;;  %v1276_v43 = vor.u32 %v1275_v11, %v1271_v62  ;;  %v1183_v30 = vshll.u32 %v4141_v5, 16  ;;  %v1284_v34 = vshrl.u32 %v4144_v12, 16  ;;  %s2613_s19 = sshll.u32 %s4005_s20, 4  ;;  %s2598_s22 = scalar_lea.sflag [#allocation5], %s327_s4  ;;  %s2614_s19 = int_to_ptr.vmem [resolvable:$true] %s2613_s19 }
 0x28d   : > { %v1170_v28 = vor.u32 %v1169_v18, %v1166_v15  ;;  %v1175_v29 = vrot.slane %v1173_v19, 5  ;;  %v1179_v33 = vrot.slane %v1177_v26, 4  ;;  %v1272_v38 = vsel %vm4107_vm12, %v1267_v13, %v1271_v62 }
 0x28e   : > { %2889 = vmatmul.msk.bf16.vlgmr.msra.gmra.mxu0 %vm1372_vm11, %v1352_v24  ;;  %v1277_v31 = vrot.slane %v1276_v43, 4  ;;  %v1287_v40 = vshll.u32 %v4144_v12, 16  ;;  %v1293_v41 = vshll.u32 %v4150_v27, 16  ;;  %v1185_v49 = vrot.slane %v1183_v30, 5  ;;  %v4187_v24 = vld [vmem:[#allocation2 + $0x20] sm:$0x1] }
 0x28f   : > { %v1171_v39 = vrot.slane %v1170_v28, 4  ;;  %v1180_v48 = vor.u32 %v1179_v33, %v1175_v29  ;;  %v1297_v50 = vshrl.u32 %v4150_v27, 16  ;;  %v1286_v55 = vrot.slane %v1284_v34, 4 }
 0x290   : > { %v1282_v47 = vsel %vm4107_vm12, %v1277_v31, %v1281_v25  ;;  %v1289_v45 = vrot.slane %v1287_v40, 5  ;;  %v1295_v61 = vrot.slane %v1293_v41, 5  ;;  %v1346_v62 = vunpack.c.l.b16 %v1272_v38  ;;  %v4191_v31 = vld [vmem:[#allocation2 + $0x54] sm:$0xf]  ;;  %s3094_s6 = sshll.u32 %s4753_s9, 5 }
 0x291   : > { %v1176_v51 = vsel %vm4107_vm12, %v1171_v39, %v1175_v29  ;;  %v1181_v59 = vrot.slane %v1180_v48, 4  ;;  %v1299_v56 = vrot.slane %v1297_v50, 4  ;;  %v1347_v63 = vunpack.c.l.b16 %v1282_v47  ;;  %v4207_v50 = vld [vmem:[#allocation2 + $0x24] sm:$0xf]  ;;  %s2610_s24 = sadd.s32 %s3167_s18, %s3094_s6  ;;  %s3485_s9 = scalar_lea.hbm %s4754_s15, 256 }
 0x292   : > { %v1188_v0 = vshrl.u32 %v4164_v14, 16  ;;  %v1191_v46 = vshll.u32 %v4164_v14, 16  ;;  %v1197_v17 = vshll.u32 %v4170_v57, 16  ;;  %v1338_v4 = vunpack.c.l.b16 %v1176_v51  ;;  %s3095_s8 = sshll.u32 %s2610_s24, 2 }
 0x293   : > { %2942 = vmatmul.msk.bf16.gmra.mxu3 %vm1372_vm11, %v4159_v44  ;;  %v1186_v58 = vsel %vm4107_vm12, %v1181_v59, %v1185_v49  ;;  %v1303_v6 = vshll.u32 %v4172_v60, 16  ;;  %v1290_v13 = vor.u32 %v1289_v45, %v1286_v55  ;;  %v1300_v15 = vor.u32 %v1299_v56, %v1295_v61  ;;  %v4210_v55 = vld [vmem:[#allocation2 + $0x48] sm:$0xff]  ;;  %s2612_s14 = scalar_lea.hbm %s4754_s15, %s3095_s8 }
 0x294   : > { %v1190_v7 = vrot.slane %v1188_v0, 4  ;;  %v1193_v10 = vrot.slane %v1191_v46, 5  ;;  %v1339_v11 = vunpack.c.l.b16 %v1186_v58  ;;  %v1201_v18 = vshrl.u32 %v4170_v57, 16  ;;  %v4213_v45 = vld [vmem:[#allocation2 + $0x28] sm:$0xf] }
 0x295   : > { %2938 = vmatmul.msk.bf16.gmra.mxu1 %vm1372_vm11, %v4168_v53  ;;  %v4185_v19 = vpack.c.b16 %v1347_v63, %v1346_v62  ;;  %v1199_v23 = vrot.slane %v1197_v17, 5  ;;  %v1291_v28 = vrot.slane %v1290_v13, 4  ;;  %v1301_v29 = vrot.slane %v1300_v15, 4  ;;  %v4217_v63 = vld [vmem:[#allocation2 + $0x18] sm:$0xff] }
 0x296   : > { %v1203_v43 = vrot.slane %v1201_v18, 4  ;;  %v1194_v25 = vor.u32 %v1193_v10, %v1190_v7  ;;  %v4189_v26 = vpack.c.b16 %v1339_v11, %v1338_v4  ;;  %v1305_v30 = vrot.slane %v1303_v6, 5 }
 0x297   : > { %v1207_v34 = vshll.u32 %v4187_v24, 16  ;;  %v1308_v38 = vshrl.u32 %v4191_v31, 16  ;;  %v1296_v39 = vsel %vm4107_vm12, %v1291_v28, %v1295_v61  ;;  %v1311_v41 = vshll.u32 %v4191_v31, 16 }
 0x298   : > { %v1204_v33 = vor.u32 %v1203_v43, %v1199_v23  ;;  %v1195_v36 = vrot.slane %v1194_v25, 4  ;;  %v1306_v40 = vsel %vm4107_vm12, %v1301_v29, %v1305_v30  ;;  %v1317_v47 = vshll.u32 %v4196_v35, 16 }
 0x299   : > { %v1209_v49 = vrot.slane %v1207_v34, 5  ;;  %v1587_v51 = vrot.slane %v4097_v21, 5  ;;  %v1321_v59 = vshrl.u32 %v4196_v35, 16  ;;  %v1348_v61 = vunpack.c.l.b16 %v1296_v39 }
 0x29a   : > { %v1205_v48 = vrot.slane %v1204_v33, 4  ;;  %v1349_v56 = vunpack.c.l.b16 %v1306_v40  ;;  %v1200_v62 = vsel %vm4107_vm12, %v1195_v36, %v1199_v23  ;;  %v1310_v0 = vrot.slane %v1308_v38, 4  ;;  %v4233_v23 = vld [vmem:[#allocation2 + $0x5c] sm:$0x1] }
 0x29b   : > { %2894 = vmatmul.msk.bf16.gmra.mxu2 %vm1372_vm11, %v4185_v19  ;;  %v1313_v46 = vrot.slane %v1311_v41, 5  ;;  %v1319_v58 = vrot.slane %v1317_v47, 5  ;;  %v1212_v17 = vshrl.u32 %v4207_v50, 16  ;;  %v1215_v21 = vshll.u32 %v4207_v50, 16  ;;  %v4244_v41 = vld [vmem:[#allocation2 + $0x2c] sm:$0x1] }
 0x29c   : > { %v1210_v4 = vsel %vm4107_vm12, %v1205_v48, %v1209_v49  ;;  %v1221_v6 = vshll.u32 %v4213_v45, 16  ;;  %v1225_v7 = vshrl.u32 %v4213_v45, 16  ;;  %v1584_v10 = vrot.slane %v4095_v20, 5 }
 0x29d   : > { %v1323_v11 = vrot.slane %v1321_v59, 4  ;;  %vm1579_vm13 = vcmask 1042432   ;;  %vm1580_vm14 = vcmask 1046532   ;;  %v2945_v13 = vrot.slane %v4093_v16, 9 }
 0x29e   : > { %2890 = vmatmul.msk.bf16.gmra.mxu0 %vm1372_vm11, %v4189_v26  ;;  %v4229_v15 = vpack.c.b16 %v1349_v56, %v1348_v61  ;;  %v1340_v18 = vunpack.c.l.b16 %v1200_v62  ;;  %vm4235_vm15 = vmor %vm1579_vm13, %vm1580_vm14  ;;  %v1586_v20 = vrot.slane %v1584_v10, 4  ;;  %v1341_v25 = vunpack.c.l.b16 %v1210_v4  ;;  %v3160_v62 = vld [vmem:[#allocation6 + $0x68] sm:$0xff] }
 0x29f   : > { %v1214_v28 = vrot.slane %v1212_v17, 4  ;;  %v1217_v29 = vrot.slane %v1215_v21, 5  ;;  %v1585_v30 = vsel %vm4235_vm15, %v2945_v13, %v1584_v10  ;;  %v1223_v16 = vrot.slane %v1221_v6, 5  ;;  %2097 = vmatpush.bf16.msra.mxu2 %v3160_v62  ;;  %v3158_v21 = vld [vmem:[#allocation6 + $0x58] sm:$0xff]  ;;  %v3164_v10 = vld [vmem:[#allocation6 + $0x88] sm:$0xff] }
 0x2a0   : > { %v1227_v33 = vrot.slane %v1225_v7, 4  ;;  %v1588_v34 = vsel %vm4235_vm15, %v1586_v20, %v1587_v51  ;;  %v1643_v36 = vunpack.c.l.b16 %v1585_v30  ;;  %v1314_v38 = vor.u32 %v1313_v46, %v1310_v0  ;;  %v3162_v46 = vld [vmem:[#allocation6 + $0x78] sm:$0xff]  ;;  %2007 = vmatpush.bf16.msrb.mxu1 %v3158_v21  ;;  %v3157_v20 = vld [vmem:[#allocation6 + $0x50] sm:$0xff]  ;;  %2305 = vmatpush.bf16.msra.mxu0 %v3164_v10 }
 0x2a1   : > { %v1324_v39 = vor.u32 %v1323_v11, %v1319_v58  ;;  %v1327_v40 = vshll.u32 %v4233_v23, 16  ;;  %v1644_v47 = vunpack.c.l.b16 %v1588_v34  ;;  %v4246_v48 = vpack.c.b16 %v1341_v25, %v1340_v18  ;;  %v4253_v11 = vld [vmem:[#allocation2 + $0x54] sm:$0xff]  ;;  %2209 = vmatpush.bf16.msra.mxu3 %v3162_v46  ;;  %v4259_v25 = vld [vmem:[#allocation2 + $0x24] sm:$0xff] }
 0x2a2   : > { %v1218_v59 = vor.u32 %v1217_v29, %v1214_v28  ;;  %v1228_v61 = vor.u32 %v1227_v33, %v1223_v16  ;;  %v1231_v56 = vshll.u32 %v4244_v41, 16  ;;  %v1315_v51 = vrot.slane %v1314_v38, 4 }
 0x2a3   : > { %2943 = vmatmul.msk.bf16.gmra.mxu3 %vm1372_vm11, %v4210_v55  ;;  %v1659_v49 = vpack.c.b16 %v1644_v47, %v1643_v36  ;;  %v1325_v17 = vrot.slane %v1324_v39, 4  ;;  %v1329_v0 = vrot.slane %v1327_v40, 5  ;;  %v1591_v28 = vrot.slane %v4132_v2, 5 }
 0x2a4   : > { %v1219_v4 = vrot.slane %v1218_v59, 4  ;;  %v1229_v6 = vrot.slane %v1228_v61, 4  ;;  %v1233_v7 = vrot.slane %v1231_v56, 5  ;;  %v1320_v13 = vsel %vm4107_vm12, %v1315_v51, %v1319_v58  ;;  %2008 = vmatpush.bf16.msrb.mxu1 %v3157_v20 }
 0x2a5   : > { %2939 = vmatmul.msk.bf16.gmra.mxu1 %vm1372_vm11, %v4217_v63  ;;  %v1330_v18 = vsel %vm4107_vm12, %v1325_v17, %v1329_v0  ;;  %v1350_v29 = vunpack.c.l.b16 %v1320_v13  ;;  %v1594_v58 = vrot.slane %v4141_v5, 5  ;;  %v2946_v2 = vrot.slane %v4126_v54, 9 }
 0x2a6   : > { %v1351_v30 = vunpack.c.l.b16 %v1330_v18  ;;  %v1224_v33 = vsel %vm4107_vm12, %v1219_v4, %v1223_v16  ;;  %v1234_v34 = vsel %vm4107_vm12, %v1229_v6, %v1233_v7  ;;  %v1593_v39 = vrot.slane %v1591_v28, 4 }
 0x2a7   : > { %v1342_v36 = vunpack.c.l.b16 %v1224_v33  ;;  %v1343_v38 = vunpack.c.l.b16 %v1234_v34  ;;  %v1592_v47 = vsel %vm4235_vm15, %v2946_v2, %v1591_v28  ;;  %v1598_v56 = vrot.slane %v4170_v57, 5  ;;  %v3163_v34 = vld [vmem:[#allocation6 + $0x80] sm:$0xff] }
 0x2a8   : > { %v4272_v40 = vpack.c.b16 %v1351_v30, %v1350_v29  ;;  %v1595_v59 = vsel %vm4235_vm15, %v1593_v39, %v1594_v58  ;;  %v1645_v5 = vunpack.c.l.b16 %v1592_v47  ;;  %v2947_v62 = vrot.slane %v4164_v14, 9  ;;  %2306 = vmatpush.bf16.msra.mxu0 %v3163_v34 }
 0x2a9   : > { %v4274_v16 = vpack.c.b16 %v1343_v38, %v1342_v36  ;;  %v1646_v61 = vunpack.c.l.b16 %v1595_v59  ;;  %v1600_v51 = vrot.slane %v1598_v56, 4  ;;  %v1601_v17 = vrot.slane %v4187_v24, 5 }
 0x2aa   : > { %v1599_v0 = vsel %vm4235_vm15, %v2947_v62, %v1598_v56  ;;  %v1605_v14 = vrot.slane %v4213_v45, 5  ;;  %v2948_v24 = vrot.slane %v4207_v50, 9  ;;  %v1612_v50 = vrot.slane %v4084_v9, 5  ;;  %v3159_v9 = vld [vmem:[#allocation6 + $0x60] sm:$0xff] }
 0x2ab   : > { %2895 = vmatmul.msk.bf16.gmra.mxu2 %vm1372_vm11, %v4229_v15  ;;  %v1660_v54 = vpack.c.b16 %v1646_v61, %v1645_v5  ;;  %v1602_v46 = vsel %vm4235_vm15, %v1600_v51, %v1601_v17  ;;  %v1647_v21 = vunpack.c.l.b16 %v1599_v0  ;;  %v1615_v18 = vrot.slane %v4086_v1, 5 }
 0x2ac   : > { %v1648_v57 = vunpack.c.l.b16 %v1602_v46  ;;  %v1607_v4 = vrot.slane %v1605_v14, 4  ;;  %v1606_v6 = vsel %vm4235_vm15, %v2948_v24, %v1605_v14  ;;  %v1614_v13 = vrot.slane %v1612_v50, 4  ;;  %2098 = vmatpush.bf16.msra.mxu2 %v3159_v9 }
 0x2ad   : > { %v1649_v45 = vunpack.c.l.b16 %v1606_v6  ;;  %v1619_v1 = vrot.slane %v4114_v42, 5  ;;  %v2950_v58 = vrot.slane %v4112_v37, 9  ;;  %v1622_v38 = vrot.slane %v4123_v52, 5 }
 0x2ae   : > { %2891 = vmatmul.msk.bf16.gmra.mxu0 %vm1372_vm11, %v4246_v48  ;;  %v1616_v28 = vsel %vm4235_vm15, %v1614_v13, %v1615_v18  ;;  %v1626_v5 = vrot.slane %v4150_v27, 5  ;;  %v2951_v52 = vrot.slane %v4144_v12, 9  ;;  %v1633_v24 = vrot.slane %v4196_v35, 5 }
 0x2af   : > { %v1652_v30 = vunpack.c.l.b16 %v1616_v28  ;;  %v1621_v36 = vrot.slane %v1619_v1, 4  ;;  %v1620_v2 = vsel %vm4235_vm15, %v2950_v58, %v1619_v1  ;;  %v1127_v1 = vld [vmem:[#allocation2 + $0x64] sm:$0xf] }
 0x2b0   : > { %v1653_v42 = vunpack.c.l.b16 %v1620_v2  ;;  %v1628_v61 = vrot.slane %v1626_v5, 4  ;;  %v1627_v51 = vsel %vm4235_vm15, %v2951_v52, %v1626_v5 }
 0x2b1   : > { %v1623_v39 = vsel %vm4235_vm15, %v1621_v36, %v1622_v38  ;;  %v1655_v46 = vunpack.c.l.b16 %v1627_v51  ;;  %v1973_v36 = vrot.slane %v1127_v1, 5 }
 0x2b2   : > { %v1654_v47 = vunpack.c.l.b16 %v1623_v39  ;;  %v1868_v39 = vshll.u32 %v1127_v1, 16 }
 0x2b3   : > { %2944 = vmatmul.msk.bf16.gmra.mxu3 %vm1372_vm11, %v4253_v11 }
 0x2b4   : > { %v4347_v59 = vpack.c.b16 %v1654_v47, %v1653_v42  ;;  %v1872_v42 = vshrl.u32 %v1127_v1, 16  ;;  %v1128_v47 = vld [vmem:[#allocation2 + $0x68] sm:$0x1] }
 0x2b5   : > { %2940 = vmatmul.msk.bf16.gmra.mxu1 %vm1372_vm11, %v4259_v25 }
 0x2bb   : > { %2896 = vmatmul.msk.bf16.gmra.mxu2 %vm1372_vm11, %v4272_v40 }
 0x2be   : > { %2892 = vmatmul.msk.bf16.gmra.mxu0 %vm1372_vm11, %v4274_v16 }
 0x2c3   : > { %2981 = vmatmul.msk.bf16.vlgmr.msrb.gmra.mxu3 %vm1372_vm11, %v4168_v53  ;;  %v4297_v53 = vpack.c.b16 %v1648_v57, %v1647_v21 }
 0x2c5   : > { %3014 = vmatmul.msk.bf16.vlgmr.msrb.gmra.mxu1 %vm1372_vm11, %v1660_v54 }
 0x2cb   : > { %2961 = vmatmul.msk.bf16.vlgmr.msrb.gmra.mxu2 %vm1372_vm11, %v1659_v49  ;;  %v1608_v49 = vrot.slane %v4244_v41, 5  ;;  %v2949_v41 = vrot.slane %v4082_v8, 9  ;;  %v3161_v8 = vld [vmem:[#allocation6 + $0x70] sm:$0xff] }
 0x2cc   : > { %2210 = vmatpush.bf16.msra.mxu3 %v3161_v8  ;;  %v1126_v8 = vld [vmem:[#allocation2 + $0x60] sm:$0xf] }
 0x2cd   : > { %v1613_v20 = vsel %vm4235_vm15, %v2949_v41, %v1612_v50  ;;  %v1859_v58 = vshrl.u32 %v1126_v8, 16  ;;  %v1862_v2 = vshll.u32 %v1126_v8, 16  ;;  %v3005_v52 = vrot.slane %v1126_v8, 9 }
 0x2ce   : > { %2997 = vmatmul.msk.bf16.vlgmr.msrb.gmra.mxu0 %vm1372_vm11, %v4189_v26  ;;  %v1609_v26 = vsel %vm4235_vm15, %v1607_v4, %v1608_v49  ;;  %v1651_v29 = vunpack.c.l.b16 %v1613_v20 }
 0x2cf   : > { %v1650_v7 = vunpack.c.l.b16 %v1609_v26  ;;  %v2952_v26 = vrot.slane %v4191_v31, 9  ;;  %v1861_v5 = vrot.slane %v1859_v58, 4 }
 0x2d0   : > { %v4330_v33 = vpack.c.b16 %v1652_v30, %v1651_v29 }
 0x2d1   : > { %v4313_v10 = vpack.c.b16 %v1650_v7, %v1649_v45  ;;  %v1635_v45 = vrot.slane %v1633_v24, 4  ;;  %v1636_v7 = vrot.slane %v4233_v23, 5  ;;  %v1634_v35 = vsel %vm4235_vm15, %v2952_v26, %v1633_v24 }
 0x2d2   : > { %v1657_v31 = vunpack.c.l.b16 %v1634_v35  ;;  %v1878_v26 = vshll.u32 %v1128_v47, 16 }
 0x2d3   : > { %2982 = vmatmul.msk.bf16.gmra.mxu3 %vm1372_vm11, %v4217_v63  ;;  %v1637_v13 = vsel %vm4235_vm15, %v1635_v45, %v1636_v7 }
 0x2d4   : > { %v1658_v9 = vunpack.c.l.b16 %v1637_v13 }
 0x2d5   : > { %3015 = vmatmul.msk.bf16.gmra.mxu1 %vm1372_vm11, %v4297_v53 }
 0x2d6   : > { %v4397_v34 = vpack.c.b16 %v1658_v9, %v1657_v31 }
 0x2db   : > { %2962 = vmatmul.msk.bf16.gmra.mxu2 %vm1372_vm11, %v1660_v54  ;;  %v1629_v54 = vrot.slane %v4172_v60, 5 }
 0x2dd   : > { %v1630_v27 = vsel %vm4235_vm15, %v1628_v61, %v1629_v54  ;;  %v1975_v61 = vrot.slane %v1973_v36, 4  ;;  %v1976_v54 = vrot.slane %v1128_v47, 5 }
 0x2de   : > { %2998 = vmatmul.msk.bf16.gmra.mxu0 %vm1372_vm11, %v4246_v48  ;;  %v1656_v12 = vunpack.c.l.b16 %v1630_v27 }
 0x2e0   : > { %v4370_v14 = vpack.c.b16 %v1656_v12, %v1655_v46  ;;  %v1870_v46 = vrot.slane %v1868_v39, 5  ;;  %v1874_v12 = vrot.slane %v1872_v42, 4 }
 0x2e3   : > { %2983 = vmatmul.msk.bf16.gmra.mxu3 %vm1372_vm11, %v4259_v25 }
 0x2e5   : > { %3016 = vmatmul.msk.bf16.gmra.mxu1 %vm1372_vm11, %v4313_v10 }
 0x2eb   : > { %2963 = vmatmul.msk.bf16.gmra.mxu2 %vm1372_vm11, %v4297_v53 }
 0x2ee   : > { %2999 = vmatmul.msk.bf16.gmra.mxu0 %vm1372_vm11, %v4274_v16 }
 0x2f3   : > { %2984 = vmatmul.msk.bf16.gmra.mxu3 %vm1372_vm11, %v4099_v22 }
 0x2f5   : > { %3017 = vmatmul.msk.bf16.gmra.mxu1 %vm1372_vm11, %v4330_v33 }
 0x2fb   : > { %2964 = vmatmul.msk.bf16.gmra.mxu2 %vm1372_vm11, %v4313_v10 }
 0x2fe   : > { %3000 = vmatmul.msk.bf16.gmra.mxu0 %vm1372_vm11, %v4135_v3 }
 0x302   : > { %v1531_v37 = vpop.f32.mrf.mxu1 }
 0x303   : > { %2985 = vmatmul.msk.bf16.gmra.mxu3 %vm1372_vm11, %v4159_v44 }
 0x305   : > { %3018 = vmatmul.msk.bf16.gmra.mxu1 %vm1372_vm11, %v4347_v59 }
 0x306   : > { %v1551_v56 = vpop.f32.mrf.mxu3 }
 0x30a   : > { %v4356_v62 = vpop.f32.mrf.mxu1 }
 0x30b   : > { %v1406_v17 = vpop.f32.mrf.mxu0  ;;  %2965 = vmatmul.msk.bf16.gmra.mxu2 %vm1372_vm11, %v4330_v33 }
 0x30c   : > { %v4364_v0 = vadd.f32 %v1531_v37, %v1406_v17  ;;  %v1864_v17 = vrot.slane %v1862_v2, 5 }
 0x30e   : > { %3001 = vmatmul.msk.bf16.gmra.mxu0 %vm1372_vm11, %v4185_v19  ;;  %v1426_v60 = vpop.f32.mrf.mxu2  ;;  %v1553_v57 = vpop.f32.mrf.mxu3 }
 0x30f   : > { %v4368_v21 = vadd.f32 %v1551_v56, %v1426_v60  ;;  %v1974_v60 = vsel %vm4235_vm15, %v3005_v52, %v1973_v36 }
 0x310   : > { %v1983_v7 = vunpack.c.l.b16 %v1974_v60  ;;  %v3166_v60 = vld [vmem:[%s4750_s12 + $0x8] sm:$0xff] }
 0x311   : > { %2458 = vmatpush.bf16.msra.mxu1 %v3166_v60 }
 0x312   : > { %v1536_v49 = vpop.f32.mrf.mxu1 }
 0x313   : > { %v4373_v4 = vpop.f32.mrf.mxu0  ;;  %2986 = vmatmul.msk.bf16.gmra.mxu3 %vm1372_vm11, %v4210_v55 }
 0x315   : > { %3019 = vmatmul.msk.bf16.gmra.mxu1 %vm1372_vm11, %v4370_v14 }
 0x316   : > { %v1428_v6 = vpop.f32.mrf.mxu2  ;;  %v1556_v41 = vpop.f32.mrf.mxu3 }
 0x317   : > { %v4381_v50 = vadd.f32 %v1553_v57, %v1428_v6  ;;  %v1977_v57 = vsel %vm4235_vm15, %v1975_v61, %v1976_v54  ;;  %v1875_v6 = vor.u32 %v1874_v12, %v1870_v46 }
 0x319   : > { %v1876_v9 = vrot.slane %v1875_v6, 4 }
 0x31a   : > { %v4391_v28 = vpop.f32.mrf.mxu1 }
 0x31b   : > { %v1411_v18 = vpop.f32.mrf.mxu0  ;;  %2966 = vmatmul.msk.bf16.gmra.mxu2 %vm1372_vm11, %v4347_v59 }
 0x31c   : > { %v4389_v20 = vadd.f32 %v1536_v49, %v1411_v18  ;;  %v1865_v49 = vor.u32 %v1864_v17, %v1861_v5 }
 0x31e   : > { %3002 = vmatmul.msk.bf16.gmra.mxu0 %vm1372_vm11, %v4229_v15  ;;  %v1431_v23 = vpop.f32.mrf.mxu2  ;;  %v1558_v30 = vpop.f32.mrf.mxu3  ;;  %v1866_v31 = vrot.slane %v1865_v49, 4 }
 0x31f   : > { %v4395_v29 = vadd.f32 %v1556_v41, %v1431_v23  ;;  %v1984_v41 = vunpack.c.l.b16 %v1977_v57  ;;  %v1880_v23 = vrot.slane %v1878_v26, 5 }
 0x320   : > { %v1871_v36 = vsel %vm4107_vm12, %v1866_v31, %v1870_v46 }
 0x321   : > { %v4423_v1 = vpack.c.b16 %v1984_v41, %v1983_v7  ;;  %v1881_v2 = vsel %vm4107_vm12, %v1876_v9, %v1880_v23  ;;  %v1887_v42 = vunpack.c.l.b16 %v1871_v36 }
 0x322   : > { %v1541_v51 = vpop.f32.mrf.mxu1  ;;  %v1888_v47 = vunpack.c.l.b16 %v1881_v2 }
 0x323   : > { %v4399_v38 = vpop.f32.mrf.mxu0  ;;  %2987 = vmatmul.msk.bf16.gmra.mxu3 %vm1372_vm11, %v4253_v11 }
 0x324   : > { %v4437_v52 = vpack.c.b16 %v1888_v47, %v1887_v42 }
 0x325   : > { %3020 = vmatmul.msk.bf16.gmra.mxu1 %vm1372_vm11, %v4397_v34 }
 0x326   : > { %v1433_v37 = vpop.f32.mrf.mxu2  ;;  %v1561_v27 = vpop.f32.mrf.mxu3 }
 0x327   : > { %v4405_v56 = vadd.f32 %v1558_v30, %v1433_v37  ;;  %v4419_v30 = vld [vmem:[#allocation2 + $0x60] sm:$0xff] }
 0x32a   : > { %v4421_v8 = vpop.f32.mrf.mxu1 }
 0x32b   : > { %v1416_v24 = vpop.f32.mrf.mxu0  ;;  %2967 = vmatmul.msk.bf16.gmra.mxu2 %vm1372_vm11, %v4370_v14 }
 0x32c   : > { %v4413_v45 = vadd.f32 %v1541_v51, %v1416_v24 }
 0x32e   : > { %3003 = vmatmul.msk.bf16.gmra.mxu0 %vm1372_vm11, %v4272_v40  ;;  %v1436_v35 = vpop.f32.mrf.mxu2  ;;  %v1563_v18 = vpop.f32.mrf.mxu3 }
 0x32f   : > { %v4417_v13 = vadd.f32 %v1561_v27, %v1436_v35 }
 0x332   : > { %v1546_v54 = vpop.f32.mrf.mxu1 }
 0x333   : > { %v4425_v58 = vpop.f32.mrf.mxu0  ;;  %2988 = vmatmul.msk.bf16.gmra.mxu3 %vm1372_vm11, %v4419_v30 }
 0x335   : > { %3021 = vmatmul.msk.bf16.gmra.mxu1 %vm1372_vm11, %v4423_v1 }
 0x336   : > { %v1438_v39 = vpop.f32.mrf.mxu2  ;;  %v1566_v5 = vpop.f32.mrf.mxu3 }
 0x337   : > { %v4435_v37 = vadd.f32 %v1563_v18, %v1438_v39 }
 0x33b   : > { %v1421_v61 = vpop.f32.mrf.mxu0  ;;  %2968 = vmatmul.msk.bf16.gmra.mxu2 %vm1372_vm11, %v4397_v34 }
 0x33c   : > { %v4441_v51 = vadd.f32 %v1546_v54, %v1421_v61 }
 0x33e   : > { %3004 = vmatmul.msk.bf16.gmra.mxu0 %vm1372_vm11, %v4437_v52  ;;  %v1441_v27 = vpop.f32.mrf.mxu2  ;;  %v1568_v46 = vpop.f32.mrf.mxu3 }
 0x33f   : > { %v4445_v17 = vadd.f32 %v1566_v5, %v1441_v27 }
 0x343   : > { %v4447_v12 = vpop.f32.mrf.mxu0  ;;  %3050 = vmatmul.msk.bf16.vlgmr.msra.gmra.mxu3 %vm1372_vm11, %v4246_v48  ;;  %v1534_v48 = vadd.f32 %v4356_v62, %v4373_v4  ;;  %v1539_v4 = vadd.f32 %v4391_v28, %v4399_v38  ;;  %v1544_v38 = vadd.f32 %v4421_v8, %v4425_v58 }
 0x346   : > { %v1443_v57 = vpop.f32.mrf.mxu2  ;;  %v1802_v49 = vpop.f32.mrf.mxu3 }
 0x347   : > { %v4454_v24 = vadd.f32 %v1568_v46, %v1443_v57 }
 0x34b   : > { %v1914_v6 = vpop.f32.mrf.mxu0  ;;  %3034 = vmatmul.msk.bf16.vlgmr.msra.gmra.mxu2 %vm1372_vm11, %v4217_v63 }
 0x34e   : > { %3067 = vmatmul.msk.bf16.vlgmr.msra.gmra.mxu0 %vm1372_vm11, %v4297_v53  ;;  %v1712_v26 = vpop.f32.mrf.mxu2  ;;  %v1804_v41 = vpop.f32.mrf.mxu3 }
 0x34f   : > { %v1752_v7 = vadd.f32 %v1712_v26, %v4364_v0 }
 0x351   : > { %v1842_v35 = vadd.f32 %v1802_v49, %v1752_v7 }
 0x353   : > { %v1916_v18 = vpop.f32.mrf.mxu0  ;;  %v4461_v31 = vadd.f32 %v1914_v6, %v1842_v35  ;;  %3051 = vmatmul.msk.bf16.gmra.mxu3 %vm1372_vm11, %v4274_v16 }
 0x356   : > { %v1714_v9 = vpop.f32.mrf.mxu2  ;;  %v1807_v63 = vpop.f32.mrf.mxu3 }
 0x357   : > { %v1753_v23 = vadd.f32 %v1714_v9, %v1534_v48  ;;  %v3165_v48 = vld [vmem:[%s4750_s12] sm:$0xff] }
 0x358   : > { %2459 = vmatpush.bf16.msra.mxu1 %v3165_v48 }
 0x359   : > { %v1843_v36 = vadd.f32 %v1804_v41, %v1753_v23 }
 0x35b   : > { %v1919_v2 = vpop.f32.mrf.mxu0  ;;  %3035 = vmatmul.msk.bf16.gmra.mxu2 %vm1372_vm11, %v4259_v25  ;;  %v4469_v53 = vadd.f32 %v1916_v18, %v1843_v36  ;;  %v1548_v18 = vpop.f32.mrf.mxu1 }
 0x35e   : > { %3068 = vmatmul.msk.bf16.gmra.mxu0 %vm1372_vm11, %v4313_v10  ;;  %v1717_v0 = vpop.f32.mrf.mxu2  ;;  %v1809_v16 = vpop.f32.mrf.mxu3 }
 0x35f   : > { %v1754_v39 = vadd.f32 %v1717_v0, %v4389_v20 }
 0x361   : > { %v1844_v42 = vadd.f32 %v1807_v63, %v1754_v39 }
 0x363   : > { %v1921_v47 = vpop.f32.mrf.mxu0  ;;  %v4474_v62 = vadd.f32 %v1919_v2, %v1844_v42  ;;  %3052 = vmatmul.msk.bf16.gmra.mxu3 %vm1372_vm11, %v4135_v3  ;;  %v1129_v42 = vld [vmem:[#allocation2 + $0x6c] sm:$0xf] }
 0x366   : > { %v1719_v25 = vpop.f32.mrf.mxu2  ;;  %v1812_v61 = vpop.f32.mrf.mxu3 }
 0x367   : > { %v1755_v5 = vadd.f32 %v1719_v25, %v1539_v4  ;;  %v1130_v4 = vld [vmem:[#allocation2 + $0x70] sm:$0xf] }
 0x369   : > { %v1845_v54 = vadd.f32 %v1809_v16, %v1755_v5  ;;  %v2157_v5 = vshrl.u32 %v1129_v42, 16 }
 0x36b   : > { %v1924_v27 = vpop.f32.mrf.mxu0  ;;  %3036 = vmatmul.msk.bf16.gmra.mxu2 %vm1372_vm11, %v4099_v22  ;;  %v4482_v10 = vadd.f32 %v1921_v47, %v1845_v54  ;;  %v2166_v54 = vshll.u32 %v1130_v4, 16 }
 0x36e   : > { %3069 = vmatmul.msk.bf16.gmra.mxu0 %vm1372_vm11, %v4330_v33  ;;  %v1722_v20 = vpop.f32.mrf.mxu2  ;;  %v1814_v3 = vpop.f32.mrf.mxu3 }
 0x36f   : > { %v1756_v46 = vadd.f32 %v1722_v20, %v4413_v45 }
 0x371   : > { %v1846_v60 = vadd.f32 %v1812_v61, %v1756_v46  ;;  %v2159_v46 = vrot.slane %v2157_v5, 4 }
 0x373   : > { %v1926_v57 = vpop.f32.mrf.mxu0  ;;  %v4487_v28 = vadd.f32 %v1924_v27, %v1846_v60  ;;  %3053 = vmatmul.msk.bf16.gmra.mxu3 %vm1372_vm11, %v4185_v19  ;;  %v2170_v27 = vshrl.u32 %v1130_v4, 16 }
 0x375   : > { %v2172_v60 = vrot.slane %v2170_v27, 4 }
 0x376   : > { %v1724_v22 = vpop.f32.mrf.mxu2  ;;  %v1817_v6 = vpop.f32.mrf.mxu3 }
 0x377   : > { %v1757_v49 = vadd.f32 %v1724_v22, %v1544_v38 }
 0x379   : > { %v1847_v26 = vadd.f32 %v1814_v3, %v1757_v49 }
 0x37b   : > { %v1929_v7 = vpop.f32.mrf.mxu0  ;;  %3037 = vmatmul.msk.bf16.gmra.mxu2 %vm1372_vm11, %v4159_v44  ;;  %v4495_v33 = vadd.f32 %v1926_v57, %v1847_v26  ;;  %v1549_v44 = vadd.f32 %v1548_v18, %v4447_v12  ;;  %v1131_v57 = vld [vmem:[#allocation2 + $0x74] sm:$0x1] }
 0x37e   : > { %3070 = vmatmul.msk.bf16.gmra.mxu0 %vm1372_vm11, %v4347_v59  ;;  %v1727_v45 = vpop.f32.mrf.mxu2  ;;  %v1819_v19 = vpop.f32.mrf.mxu3 }
 0x37f   : > { %v1758_v41 = vadd.f32 %v1727_v45, %v4441_v51 }
 0x381   : > { %v1848_v35 = vadd.f32 %v1817_v6, %v1758_v41 }
 0x383   : > { %v1931_v8 = vpop.f32.mrf.mxu0  ;;  %v4500_v58 = vadd.f32 %v1929_v7, %v1848_v35  ;;  %3054 = vmatmul.msk.bf16.gmra.mxu3 %vm1372_vm11, %v4229_v15  ;;  %v2176_v7 = vshll.u32 %v1131_v57, 16 }
 0x385   : > { %v2178_v35 = vrot.slane %v2176_v7, 5 }
 0x386   : > { %v1729_v59 = vpop.f32.mrf.mxu2  ;;  %v1822_v23 = vpop.f32.mrf.mxu3 }
 0x387   : > { %v1759_v9 = vadd.f32 %v1729_v59, %v1549_v44 }
 0x389   : > { %v1849_v51 = vadd.f32 %v1819_v19, %v1759_v9 }
 0x38b   : > { %v1934_v63 = vpop.f32.mrf.mxu0  ;;  %3038 = vmatmul.msk.bf16.gmra.mxu2 %vm1372_vm11, %v4210_v55  ;;  %v4510_v36 = vadd.f32 %v1931_v8, %v1849_v51 }
 0x38e   : > { %3071 = vmatmul.msk.bf16.gmra.mxu0 %vm1372_vm11, %v4370_v14  ;;  %v1732_v2 = vpop.f32.mrf.mxu2  ;;  %v1824_v15 = vpop.f32.mrf.mxu3  ;;  %v2160_v14 = vshll.u32 %v1129_v42, 16 }
 0x38f   : > { %v1760_v0 = vadd.f32 %v1732_v2, %v4368_v21 }
 0x390   : > { %v2162_v3 = vrot.slane %v2160_v14, 5 }
 0x391   : > { %v1850_v39 = vadd.f32 %v1822_v23, %v1760_v0  ;;  %v2010_v23 = vpop.f32.mrf.mxu1 }
 0x392   : > { %v2163_v6 = vor.u32 %v2162_v3, %v2159_v46 }
 0x393   : > { %v1936_v12 = vpop.f32.mrf.mxu0  ;;  %v4515_v16 = vadd.f32 %v1934_v63, %v1850_v39  ;;  %3055 = vmatmul.msk.bf16.gmra.mxu3 %vm1372_vm11, %v4272_v40  ;;  %v2168_v40 = vrot.slane %v2166_v54, 5  ;;  %v2274_v39 = vrot.slane %v1131_v57, 5  ;;  %v3146_v54 = vld [vmem:[#allocation2 + $0x6c] sm:$0xff] }
 0x394   : > { %v2164_v41 = vrot.slane %v2163_v6, 4 }
 0x395   : > { %v2173_v26 = vor.u32 %v2172_v60, %v2168_v40 }
 0x396   : > { %v1734_v47 = vpop.f32.mrf.mxu2  ;;  %v1827_v25 = vpop.f32.mrf.mxu3 }
 0x397   : > { %v1761_v55 = vadd.f32 %v1734_v47, %v4381_v50  ;;  %v2174_v19 = vrot.slane %v2173_v26, 4 }
 0x399   : > { %v1851_v61 = vadd.f32 %v1824_v15, %v1761_v55  ;;  %v2179_v44 = vsel %vm4107_vm12, %v2174_v19, %v2178_v35  ;;  %v3058_v15 = vrot.slane %v1129_v42, 9  ;;  %v2050_v19 = vadd.f32 %v2010_v23, %v4461_v31 }
 0x39a   : > { %v2186_v63 = vunpack.c.l.b16 %v2179_v44 }
 0x39b   : > { %v1939_v21 = vpop.f32.mrf.mxu0  ;;  %3039 = vmatmul.msk.bf16.gmra.mxu2 %vm1372_vm11, %v4253_v11  ;;  %v4522_v20 = vadd.f32 %v1936_v12, %v1851_v61 }
 0x39e   : > { %3072 = vmatmul.msk.bf16.gmra.mxu0 %vm1372_vm11, %v4397_v34  ;;  %v1737_v50 = vpop.f32.mrf.mxu2  ;;  %v1829_v22 = vpop.f32.mrf.mxu3 }
 0x39f   : > { %v1762_v38 = vadd.f32 %v1737_v50, %v4395_v29  ;;  %v2169_v29 = vsel %vm4107_vm12, %v2164_v41, %v2168_v40 }
 0x3a0   : > { %v2185_v51 = vunpack.c.l.b16 %v2169_v29 }
 0x3a1   : > { %v1852_v49 = vadd.f32 %v1827_v25, %v1762_v38 }
 0x3a2   : > { %v2187_v12 = vpack.c.b16 %v2186_v63, %v2185_v51 }
 0x3a3   : > { %v1941_v45 = vpop.f32.mrf.mxu0  ;;  %v4527_v11 = vadd.f32 %v1939_v21, %v1852_v49  ;;  %3056 = vmatmul.msk.bf16.gmra.mxu3 %vm1372_vm11, %v4437_v52  ;;  %v2271_v52 = vrot.slane %v1130_v4, 5 }
 0x3a5   : > { %v2273_v32 = vrot.slane %v2271_v52, 4  ;;  %v2272_v4 = vsel %vm4235_vm15, %v3058_v15, %v2271_v52 }
 0x3a6   : > { %v1739_v18 = vpop.f32.mrf.mxu2  ;;  %v1832_v8 = vpop.f32.mrf.mxu3 }
 0x3a7   : > { %v1763_v34 = vadd.f32 %v1739_v18, %v4405_v56  ;;  %v2275_v25 = vsel %vm4235_vm15, %v2273_v32, %v2274_v39 }
 0x3a8   : > { %v2282_v61 = vunpack.c.l.b16 %v2275_v25 }
 0x3a9   : > { %v1853_v48 = vadd.f32 %v1829_v22, %v1763_v34 }
 0x3ab   : > { %v1944_v59 = vpop.f32.mrf.mxu0  ;;  %3040 = vmatmul.msk.bf16.gmra.mxu2 %vm1372_vm11, %v4419_v30  ;;  %v4538_v9 = vadd.f32 %v1941_v45, %v1853_v48 }
 0x3ae   : > { %3073 = vmatmul.msk.bf16.gmra.mxu0 %vm1372_vm11, %v4423_v1  ;;  %v1742_v56 = vpop.f32.mrf.mxu2  ;;  %v1834_v0 = vpop.f32.mrf.mxu3 }
 0x3af   : > { %v1764_v2 = vadd.f32 %v1742_v56, %v4417_v13  ;;  %v2012_v1 = vpop.f32.mrf.mxu1  ;;  %v2281_v13 = vunpack.c.l.b16 %v2272_v4 }
 0x3b0   : > { %v2051_v29 = vadd.f32 %v2012_v1, %v4469_v53 }
 0x3b1   : > { %v1854_v47 = vadd.f32 %v1832_v8, %v1764_v2  ;;  %v2283_v21 = vpack.c.b16 %v2282_v61, %v2281_v13 }
 0x3b3   : > { %v1946_v55 = vpop.f32.mrf.mxu0  ;;  %v4543_v30 = vadd.f32 %v1944_v59, %v1854_v47  ;;  %3057 = vmatmul.msk.bf16.gmra.mxu3 %vm1372_vm11, %v2187_v12 }
 0x3b6   : > { %v1744_v5 = vpop.f32.mrf.mxu2  ;;  %v1837_v14 = vpop.f32.mrf.mxu3 }
 0x3b7   : > { %v1765_v42 = vadd.f32 %v1744_v5, %v4435_v37  ;;  %v2015_v50 = vpop.f32.mrf.mxu1 }
 0x3b8   : > { %v2052_v2 = vadd.f32 %v2015_v50, %v4474_v62 }
 0x3b9   : > { %v1855_v27 = vadd.f32 %v1834_v0, %v1765_v42 }
 0x3bb   : > { %v1949_v46 = vpop.f32.mrf.mxu0  ;;  %3041 = vmatmul.msk.bf16.gmra.mxu2 %vm1372_vm11, %v3146_v54  ;;  %v4552_v3 = vadd.f32 %v1946_v55, %v1855_v27 }
 0x3be   : > { %3074 = vmatmul.msk.bf16.gmra.mxu0 %vm1372_vm11, %v2283_v21  ;;  %v1747_v43 = vpop.f32.mrf.mxu2  ;;  %v1839_v60 = vpop.f32.mrf.mxu3 }
 0x3bf   : > { %v1766_v40 = vadd.f32 %v1747_v43, %v4445_v17  ;;  %v2017_v7 = vpop.f32.mrf.mxu1 }
 0x3c0   : > { %v2053_v1 = vadd.f32 %v2017_v7, %v4482_v10 }
 0x3c1   : > { %v1856_v57 = vadd.f32 %v1837_v14, %v1766_v40 }
 0x3c3   : > { %v1951_v38 = vpop.f32.mrf.mxu0  ;;  %v4556_v22 = vadd.f32 %v1949_v46, %v1856_v57 }
 0x3c6   : > { %v1749_v37 = vpop.f32.mrf.mxu2  ;;  %v2212_v6 = vpop.f32.mrf.mxu3 }
 0x3c7   : > { %v1767_v49 = vadd.f32 %v1749_v37, %v4454_v24  ;;  %v2020_v48 = vpop.f32.mrf.mxu1  ;;  %v4566_v24 = vld [vmem:[%s4751_s21] ss:$0 sm:$0xff] }
 0x3c8   : > { %v2054_v46 = vadd.f32 %v2020_v48, %v4487_v28 }
 0x3c9   : > { %v1857_v26 = vadd.f32 %v1839_v60, %v1767_v49 }
 0x3cb   : > { %v2308_v45 = vpop.f32.mrf.mxu0  ;;  %v4559_v41 = vadd.f32 %v1951_v38, %v1857_v26 }
 0x3ce   : > { %v2100_v35 = vpop.f32.mrf.mxu2  ;;  %v2214_v17 = vpop.f32.mrf.mxu3 }
 0x3cf   : > { %v2140_v18 = vadd.f32 %v2100_v35, %v2050_v19  ;;  %v2022_v15 = vpop.f32.mrf.mxu1 }
 0x3d0   : > { %v2055_v26 = vadd.f32 %v2022_v15, %v4495_v33 }
 0x3d1   : > { %v2252_v34 = vadd.f32 %v2212_v6, %v2140_v18 }
 0x3d3   : > { %v2310_v8 = vpop.f32.mrf.mxu0  ;;  %v2348_v59 = vadd.f32 %v2308_v45, %v2252_v34 }
 0x3d5   : > { %v2368_v31 = vadd.f32 %v4566_v24, %v2348_v59 }
 0x3d6   : > { %v2102_v44 = vpop.f32.mrf.mxu2  ;;  %v2217_v51 = vpop.f32.mrf.mxu3 }
 0x3d7   : > { %v2141_v52 = vadd.f32 %v2102_v44, %v2051_v29  ;;  %v2384_v32 = vmax.f32 %v2368_v31, 0.0  ;;  %v2025_v62 = vpop.f32.mrf.mxu1 }
 0x3d8   : > { %v2056_v48 = vadd.f32 %v2025_v62, %v4500_v58 }
 0x3d9   : > { %v2253_v63 = vadd.f32 %v2214_v17, %v2141_v52 }
 0x3db   : > { %v2349_v23 = vadd.f32 %v2310_v8, %v2253_v63  ;;  %v2313_v56 = vpop.f32.mrf.mxu0 }
 0x3dd   : > { %v2369_v0 = vadd.f32 %v4566_v24, %v2349_v23 }
 0x3de   : > { %v2105_v53 = vpop.f32.mrf.mxu2  ;;  %v2219_v47 = vpop.f32.mrf.mxu3 }
 0x3df   : > { %v2385_v39 = vmax.f32 %v2369_v0, 0.0  ;;  %v2142_v12 = vadd.f32 %v2105_v53, %v2052_v2  ;;  %v2027_v37 = vpop.f32.mrf.mxu1 }
 0x3e1   : > { %v2400_v55 = vpack.c.bf16 %v2385_v39, %v2384_v32  ;;  %v2254_v4 = vadd.f32 %v2217_v51, %v2142_v12 }
 0x3e3   : > { %v2315_v25 = vpop.f32.mrf.mxu0  ;;  %3083 = vmatmul.msk.bf16.vlgmr.msra.gmra.mxu1 %vm1372_vm11, %v2400_v55  ;;  %v2350_v13 = vadd.f32 %v2313_v56, %v2254_v4  ;;  %v2057_v56 = vadd.f32 %v2027_v37, %v4510_v36 }
 0x3e5   : > { %v2370_v54 = vadd.f32 %v4566_v24, %v2350_v13 }
 0x3e6   : > { %v2107_v5 = vpop.f32.mrf.mxu2  ;;  %v2222_v42 = vpop.f32.mrf.mxu3 }
 0x3e7   : > { %v2143_v61 = vadd.f32 %v2107_v5, %v2053_v1  ;;  %v2386_v60 = vmax.f32 %v2370_v54, 0.0  ;;  %v2030_v8 = vpop.f32.mrf.mxu1 }
 0x3e8   : > { %v2058_v55 = vadd.f32 %v2030_v8, %v4515_v16 }
 0x3e9   : > { %v2255_v14 = vadd.f32 %v2219_v47, %v2143_v61 }
 0x3eb   : > { %v2351_v27 = vadd.f32 %v2315_v25, %v2255_v14  ;;  %v2318_v21 = vpop.f32.mrf.mxu0 }
 0x3ed   : > { %v2371_v43 = vadd.f32 %v4566_v24, %v2351_v27 }
 0x3ee   : > { %v2110_v40 = vpop.f32.mrf.mxu2  ;;  %v2224_v38 = vpop.f32.mrf.mxu3 }
 0x3ef   : > { %v2387_v50 = vmax.f32 %v2371_v43, 0.0  ;;  %v2144_v57 = vadd.f32 %v2110_v40, %v2054_v46  ;;  %v2032_v2 = vpop.f32.mrf.mxu1 }
 0x3f0   : > { %v2059_v54 = vadd.f32 %v2032_v2, %v4522_v20 }
 0x3f1   : > { %v2401_v10 = vpack.c.bf16 %v2387_v50, %v2386_v60  ;;  %v2256_v49 = vadd.f32 %v2222_v42, %v2144_v57 }
 0x3f3   : > { %v2320_v6 = vpop.f32.mrf.mxu0  ;;  %3084 = vmatmul.msk.bf16.gmra.mxu1 %vm1372_vm11, %v2401_v10  ;;  %v2352_v45 = vadd.f32 %v2318_v21, %v2256_v49 }
 0x3f5   : > { %v2372_v18 = vadd.f32 %v4566_v24, %v2352_v45 }
 0x3f6   : > { %v2112_v7 = vpop.f32.mrf.mxu2  ;;  %v2227_v35 = vpop.f32.mrf.mxu3 }
 0x3f7   : > { %v2145_v19 = vadd.f32 %v2112_v7, %v2055_v26  ;;  %v2388_v59 = vmax.f32 %v2372_v18, 0.0  ;;  %v2035_v36 = vpop.f32.mrf.mxu1 }
 0x3f9   : > { %v2257_v28 = vadd.f32 %v2224_v38, %v2145_v19  ;;  %v2060_v38 = vadd.f32 %v2035_v36, %v4527_v11 }
 0x3fb   : > { %v2353_v17 = vadd.f32 %v2320_v6, %v2257_v28  ;;  %v2323_v34 = vpop.f32.mrf.mxu0 }
 0x3fd   : > { %v2373_v29 = vadd.f32 %v4566_v24, %v2353_v17 }
 0x3fe   : > { %v2115_v44 = vpop.f32.mrf.mxu2  ;;  %v2229_v63 = vpop.f32.mrf.mxu3 }
 0x3ff   : > { %v2389_v52 = vmax.f32 %v2373_v29, 0.0  ;;  %v2146_v51 = vadd.f32 %v2115_v44, %v2056_v48  ;;  %v2037_v40 = vpop.f32.mrf.mxu1 }
 0x400   : > { %v2061_v28 = vadd.f32 %v2037_v40, %v4538_v9 }
 0x401   : > { %v2402_v33 = vpack.c.bf16 %v2389_v52, %v2388_v59  ;;  %v2258_v31 = vadd.f32 %v2227_v35, %v2146_v51 }
 0x403   : > { %v2325_v23 = vpop.f32.mrf.mxu0  ;;  %3085 = vmatmul.msk.bf16.gmra.mxu1 %vm1372_vm11, %v2402_v33  ;;  %v2354_v15 = vadd.f32 %v2323_v34, %v2258_v31 }
 0x405   : > { %v2374_v39 = vadd.f32 %v4566_v24, %v2354_v15 }
 0x406   : > { %v2117_v0 = vpop.f32.mrf.mxu2  ;;  %v2232_v32 = vpop.f32.mrf.mxu3 }
 0x407   : > { %v2147_v53 = vadd.f32 %v2117_v0, %v2057_v56  ;;  %v2390_v1 = vmax.f32 %v2374_v39, 0.0  ;;  %v2040_v35 = vpop.f32.mrf.mxu1 }
 0x408   : > { %v2062_v59 = vadd.f32 %v2040_v35, %v4543_v30 }
 0x409   : > { %v2259_v58 = vadd.f32 %v2229_v63, %v2147_v53 }
 0x40b   : > { %v2355_v12 = vadd.f32 %v2325_v23, %v2259_v58  ;;  %v2328_v47 = vpop.f32.mrf.mxu0 }
 0x40d   : > { %v2375_v4 = vadd.f32 %v4566_v24, %v2355_v12 }
 0x40e   : > { %v2120_v25 = vpop.f32.mrf.mxu2  ;;  %v2234_v61 = vpop.f32.mrf.mxu3 }
 0x40f   : > { %v2391_v5 = vmax.f32 %v2375_v4, 0.0  ;;  %v2148_v13 = vadd.f32 %v2120_v25, %v2058_v55  ;;  %v2042_v51 = vpop.f32.mrf.mxu1 }
 0x410   : > { %v2063_v0 = vadd.f32 %v2042_v51, %v4552_v3 }
 0x411   : > { %v2403_v42 = vpack.c.bf16 %v2391_v5, %v2390_v1  ;;  %v2260_v62 = vadd.f32 %v2232_v32, %v2148_v13 }
 0x413   : > { %v2330_v14 = vpop.f32.mrf.mxu0  ;;  %3086 = vmatmul.msk.bf16.gmra.mxu1 %vm1372_vm11, %v2403_v42  ;;  %v2356_v21 = vadd.f32 %v2328_v47, %v2260_v62 }
 0x415   : > { %v2376_v60 = vadd.f32 %v4566_v24, %v2356_v21 }
 0x416   : > { %v2122_v27 = vpop.f32.mrf.mxu2  ;;  %v2237_v43 = vpop.f32.mrf.mxu3 }
 0x417   : > { %v2149_v46 = vadd.f32 %v2122_v27, %v2059_v54  ;;  %v2392_v49 = vmax.f32 %v2376_v60, 0.0  ;;  %v2045_v39 = vpop.f32.mrf.mxu1 }
 0x418   : > { %v2064_v55 = vadd.f32 %v2045_v39, %v4556_v22 }
 0x419   : > { %v2261_v16 = vadd.f32 %v2234_v61, %v2149_v46 }
 0x41b   : > { %v2357_v50 = vadd.f32 %v2330_v14, %v2261_v16  ;;  %v2333_v57 = vpop.f32.mrf.mxu0 }
 0x41d   : > { %v2377_v10 = vadd.f32 %v4566_v24, %v2357_v50 }
 0x41e   : > { %v2125_v37 = vpop.f32.mrf.mxu2  ;;  %v2239_v7 = vpop.f32.mrf.mxu3 }
 0x41f   : > { %v2393_v6 = vmax.f32 %v2377_v10, 0.0  ;;  %v2150_v26 = vadd.f32 %v2125_v37, %v2060_v38  ;;  %v2047_v42 = vpop.f32.mrf.mxu1  ;;  %v4609_v10 = vld [vmem:[%s4752_s17] ss:$0 sm:$0xff] }
 0x420   : > { %v2065_v14 = vadd.f32 %v2047_v42, %v4559_v41  ;;  %v3169_v37 = vld [vmem:[%s3833_s13] sm:$0xff]  }
 0x421   : > { %v2404_v20 = vpack.c.bf16 %v2393_v6, %v2392_v49  ;;  %v2262_v45 = vadd.f32 %v2237_v43, %v2150_v26  ;;  %v3170_v6 = vunpack.c.l.bf16 %v3169_v37  ;;  %v3171_v26 = vunpack.c.h.bf16 %v3169_v37 }
 0x423   : > { %v2335_v19 = vpop.f32.mrf.mxu0  ;;  %3087 = vmatmul.msk.bf16.gmra.mxu1 %vm1372_vm11, %v2404_v20  ;;  %v2358_v17 = vadd.f32 %v2333_v57, %v2262_v45 }
 0x425   : > { %v2378_v48 = vadd.f32 %v4566_v24, %v2358_v17  ;;  %v3240_v17 = vld [vmem:[%s3833_s13 + $0x8] sm:$0xff]  }
 0x426   : > { %v2127_v18 = vpop.f32.mrf.mxu2  ;;  %v2242_v11 = vpop.f32.mrf.mxu3 }
 0x427   : > { %v2151_v34 = vadd.f32 %v2127_v18, %v2061_v28  ;;  %v2394_v33 = vmax.f32 %v2378_v48, 0.0 }
 0x429   : > { %v2263_v8 = vadd.f32 %v2239_v7, %v2151_v34 }
 0x42b   : > { %v2359_v29 = vadd.f32 %v2335_v19, %v2263_v8  ;;  %v2338_v44 = vpop.f32.mrf.mxu0  ;;  %v3174_v8 = vunpack.c.l.bf16 %v3240_v17 }
 0x42d   : > { %v2379_v52 = vadd.f32 %v4566_v24, %v2359_v29 }
 0x42e   : > { %v2130_v63 = vpop.f32.mrf.mxu2  ;;  %v2244_v2 = vpop.f32.mrf.mxu3 }
 0x42f   : > { %v2395_v31 = vmax.f32 %v2379_v52, 0.0  ;;  %v2152_v23 = vadd.f32 %v2130_v63, %v2062_v59 }
 0x431   : > { %v2405_v56 = vpack.c.bf16 %v2395_v31, %v2394_v33  ;;  %v2264_v9 = vadd.f32 %v2242_v11, %v2152_v23  ;;  %v3175_v11 = vunpack.c.h.bf16 %v3240_v17  ;;  %v3241_v31 = vld [vmem:[%s3833_s13 + $0x10] sm:$0xff]  }
 0x433   : > { %3088 = vmatmul.msk.bf16.gmra.mxu1 %vm1372_vm11, %v2405_v56  ;;  %v2340_v15 = vpop.f32.mrf.mxu0  ;;  %v2360_v32 = vadd.f32 %v2338_v44, %v2264_v9  ;;  %v3178_v56 = vunpack.c.l.bf16 %v3241_v31  ;;  %v3179_v9 = vunpack.c.h.bf16 %v3241_v31 }
 0x435   : > { %v2380_v12 = vadd.f32 %v4566_v24, %v2360_v32 }
 0x436   : > { %v2132_v53 = vpop.f32.mrf.mxu2  ;;  %v2247_v25 = vpop.f32.mrf.mxu3 }
 0x437   : > { %v2153_v58 = vadd.f32 %v2132_v53, %v2063_v0  ;;  %v2396_v5 = vmax.f32 %v2380_v12, 0.0  ;;  %v3242_v12 = vld [vmem:[%s3833_s13 + $0x18] sm:$0xff]  }
 0x439   : > { %v2265_v30 = vadd.f32 %v2244_v2, %v2153_v58 }
 0x43b   : > { %v2361_v47 = vadd.f32 %v2340_v15, %v2265_v30  ;;  %v2343_v36 = vpop.f32.mrf.mxu0 }
 0x43d   : > { %v2381_v4 = vadd.f32 %v4566_v24, %v2361_v47 }
 0x43e   : > { %v2135_v1 = vpop.f32.mrf.mxu2  ;;  %v2249_v22 = vpop.f32.mrf.mxu3 }
 0x43f   : > { %v2397_v13 = vmax.f32 %v2381_v4, 0.0  ;;  %v2154_v61 = vadd.f32 %v2135_v1, %v2064_v55  ;;  %v3182_v55 = vunpack.c.l.bf16 %v3242_v12  ;;  %v3183_v4 = vunpack.c.h.bf16 %v3242_v12 }
 0x441   : > { %v2406_v3 = vpack.c.bf16 %v2397_v13, %v2396_v5  ;;  %v2266_v62 = vadd.f32 %v2247_v25, %v2154_v61 }
 0x443   : > { %3089 = vmatmul.msk.bf16.gmra.mxu1 %vm1372_vm11, %v2406_v3  ;;  %v2362_v27 = vadd.f32 %v2343_v36, %v2266_v62  ;;  %v2345_v43 = vpop.f32.mrf.mxu0  ;;  %v3243_v62 = vld [vmem:[%s3833_s13 + $0x20] sm:$0xff]  }
 0x445   : > { %v2382_v16 = vadd.f32 %v4566_v24, %v2362_v27  ;;  %v3187_v27 = vunpack.c.h.bf16 %v3243_v62 }
 0x446   : > { %v2137_v54 = vpop.f32.mrf.mxu2 }
 0x447   : > { %v2155_v21 = vadd.f32 %v2137_v54, %v2065_v14  ;;  %v2398_v50 = vmax.f32 %v2382_v16, 0.0  ;;  %v3186_v54 = vunpack.c.l.bf16 %v3243_v62 }
 0x449   : > { %v2267_v46 = vadd.f32 %v2249_v22, %v2155_v21 }
 0x44b   : > { %v2363_v40 = vadd.f32 %v2345_v43, %v2267_v46 }
 0x44d   : > { %v2383_v60 = vadd.f32 %v4566_v24, %v2363_v40 }
 0x44f   : > { %v2399_v57 = vmax.f32 %v2383_v60, 0.0 }
 0x451   : > { %v2407_v38 = vpack.c.bf16 %v2399_v57, %v2398_v50  ;;  %v3244_v57 = vld [vmem:[%s3833_s13 + $0x28] sm:$0xff]  }
 0x452   : > { %v3191_v37 = vunpack.c.h.bf16 %v3244_v57 }
 0x453   : > { %3090 = vmatmul.msk.bf16.gmra.mxu1 %vm1372_vm11, %v2407_v38 }
 0x460   : > { %v2461_v41 = vpop.f32.mrf.mxu1 }
 0x461   : > { %v2462_v49 = vadd.f32 %v4609_v10, %v2461_v41  ;;  %v3190_v41 = vunpack.c.l.bf16 %v3244_v57 }
 0x463   : > { %v2533_v24 = vadd.f32 %v3170_v6, %v2462_v49 }
 0x465   : > { %v2549_v19 = vmax.f32 %v2533_v24, 0.0 }
 0x468   : > { %v2463_v7 = vpop.f32.mrf.mxu1 }
 0x469   : > { %v2464_v20 = vadd.f32 %v4609_v10, %v2463_v7 }
 0x46b   : > { %v2534_v45 = vadd.f32 %v3171_v26, %v2464_v20 }
 0x46d   : > { %v2550_v35 = vmax.f32 %v2534_v45, 0.0 }
 0x46f   : > { %v3203_v28 = vpack.c.bf16 %v2550_v35, %v2549_v19  ;;  %v3245_v35 = vld [vmem:[%s3833_s13 + $0x30] sm:$0xff]  }
 0x470   : > { %v2466_v18 = vpop.f32.mrf.mxu1  ;;  %v3195_v17 = vunpack.c.h.bf16 %v3245_v35 }
 0x471   : > { %3204 = vst [vmem:[%s4005_s20] sm:$0xff] %v3203_v28   ;;  %v2467_v34 = vadd.f32 %v4609_v10, %v2466_v18  ;;  %v3194_v18 = vunpack.c.l.bf16 %v3245_v35 }
 0x473   : > { %v2535_v29 = vadd.f32 %v3174_v8, %v2467_v34 }
 0x475   : > { %v2551_v52 = vmax.f32 %v2535_v29, 0.0 }
 0x478   : > { %v2468_v48 = vpop.f32.mrf.mxu1 }
 0x479   : > { %v2469_v44 = vadd.f32 %v4609_v10, %v2468_v48 }
 0x47b   : > { %v2536_v59 = vadd.f32 %v3175_v11, %v2469_v44 }
 0x47d   : > { %v2552_v51 = vmax.f32 %v2536_v59, 0.0 }
 0x47f   : > { %v3208_v63 = vpack.c.bf16 %v2552_v51, %v2551_v52  ;;  %v3246_v51 = vld [vmem:[%s3833_s13 + $0x38] sm:$0xff]   ;;  %s2615_s13 = sshll.u32 %s2612_s14, 4  ;;  %s2616_s13 = int_to_ptr.hbm [resolvable:$true] %s2615_s13 }
 0x480   : > { %v2471_v33 = vpop.f32.mrf.mxu1  ;;  %v3199_v31 = vunpack.c.h.bf16 %v3246_v51  ;;  %s3479_s21 = sshra.s32 %s2616_s13, 4  ;;  %s3480_s21 = int_to_ptr.hbm [resolvable:$true] %s3479_s21 }
 0x481   : > { %3247 = vst [vmem:[%s4005_s20 + $0x8] sm:$0xff] %v3208_v63   ;;  %v2472_v23 = vadd.f32 %v4609_v10, %v2471_v33  ;;  %v3198_v33 = vunpack.c.l.bf16 %v3246_v51  ;;  %s3481_s23 = scalar_lea.hbm %s3480_s21, 64  ;;  %p3486_p3 = scmp.lt.s32.totalorder %s3480_s21, %s4754_s15 }
 0x482   : > { %p3482_p11 = scmp.ne.s32.totalorder %s3480_s21, %s3481_s23  ;;  %p3487_p5 = scmp.lt.s32.totalorder %s3485_s9, %s3481_s23 }
 0x483   : > { %v2537_v0 = vadd.f32 %v3178_v56, %v2472_v23 }
 0x484   : > { %p3483_p0 = pnand %p3482_p11, %p3709_p6  ;;  %p3488_p7 = por %p3487_p5, %p3486_p3 }
 0x485   : > { %v2553_v32 = vmax.f32 %v2537_v0, 0.0 }
 0x486   : > { %p3484_p2 = pneg %p3483_p0 }
 0x488   : > { %v2473_v2 = vpop.f32.mrf.mxu1  ;;  %p3489_p8 = pnand %p3488_p7, %p3484_p2 }
 0x489   : > { %v2474_v15 = vadd.f32 %v4609_v10, %v2473_v2 }
 0x48b   : > { %v2538_v53 = vadd.f32 %v3179_v9, %v2474_v15 }
 0x48d   : > { %v2554_v58 = vmax.f32 %v2538_v53, 0.0 }
 0x48f   : > { %v3213_v39 = vpack.c.bf16 %v2554_v58, %v2553_v32 }
 0x490   : > { %v2476_v30 = vpop.f32.mrf.mxu1 }
 0x491   : > { %3248 = vst [vmem:[%s4005_s20 + $0x10] sm:$0xff] %v3213_v39   ;;  %v2477_v47 = vadd.f32 %v4609_v10, %v2476_v30 }
 0x493   : > { %v2539_v1 = vadd.f32 %v3182_v55, %v2477_v47 }
 0x495   : > { %v2555_v61 = vmax.f32 %v2539_v1, 0.0 }
 0x498   : > { %v2478_v25 = vpop.f32.mrf.mxu1 }
 0x499   : > { %v2479_v5 = vadd.f32 %v4609_v10, %v2478_v25 }
 0x49b   : > { %v2540_v13 = vadd.f32 %v3183_v4, %v2479_v5 }
 0x49d   : > { %v2556_v36 = vmax.f32 %v2540_v13, 0.0 }
 0x49f   : > { %v3218_v3 = vpack.c.bf16 %v2556_v36, %v2555_v61 }
 0x4a0   : > { %v2481_v42 = vpop.f32.mrf.mxu1 }
 0x4a1   : > { %3249 = vst [vmem:[%s4005_s20 + $0x18] sm:$0xff] %v3218_v3   ;;  %v2482_v14 = vadd.f32 %v4609_v10, %v2481_v42 }
 0x4a3   : > { %v2541_v22 = vadd.f32 %v3186_v54, %v2482_v14 }
 0x4a5   : > { %v2557_v16 = vmax.f32 %v2541_v22, 0.0 }
 0x4a8   : > { %v2483_v21 = vpop.f32.mrf.mxu1 }
 0x4a9   : > { %v2484_v46 = vadd.f32 %v4609_v10, %v2483_v21 }
 0x4ab   : > { %v2542_v43 = vadd.f32 %v3187_v27, %v2484_v46 }
 0x4ad   : > { %v2558_v40 = vmax.f32 %v2542_v43, 0.0 }
 0x4af   : > { %v3223_v60 = vpack.c.bf16 %v2558_v40, %v2557_v16 }
 0x4b0   : > { %v2486_v50 = vpop.f32.mrf.mxu1 }
 0x4b1   : > { %3250 = vst [vmem:[%s4005_s20 + $0x20] sm:$0xff] %v3223_v60   ;;  %v2487_v38 = vadd.f32 %v4609_v10, %v2486_v50 }
 0x4b3   : > { %v2543_v6 = vadd.f32 %v3190_v41, %v2487_v38 }
 0x4b5   : > { %v2559_v24 = vmax.f32 %v2543_v6, 0.0 }
 0x4b8   : > { %v2488_v49 = vpop.f32.mrf.mxu1 }
 0x4b9   : > { %v2489_v26 = vadd.f32 %v4609_v10, %v2488_v49 }
 0x4bb   : > { %v2544_v7 = vadd.f32 %v3191_v37, %v2489_v26 }
 0x4bd   : > { %v2560_v20 = vmax.f32 %v2544_v7, 0.0 }
 0x4bf   : > { %v3228_v45 = vpack.c.bf16 %v2560_v20, %v2559_v24 }
 0x4c0   : > { %v2491_v19 = vpop.f32.mrf.mxu1 }
 0x4c1   : > { %3251 = vst [vmem:[%s4005_s20 + $0x28] sm:$0xff] %v3228_v45   ;;  %v2492_v28 = vadd.f32 %v4609_v10, %v2491_v19 }
 0x4c3   : > { %v2545_v8 = vadd.f32 %v3194_v18, %v2492_v28 }
 0x4c5   : > { %v2561_v29 = vmax.f32 %v2545_v8, 0.0 }
 0x4c8   : > { %v2493_v34 = vpop.f32.mrf.mxu1 }
 0x4c9   : > { %v2494_v11 = vadd.f32 %v4609_v10, %v2493_v34 }
 0x4cb   : > { %v2546_v48 = vadd.f32 %v3195_v17, %v2494_v11 }
 0x4cd   : > { %v2562_v44 = vmax.f32 %v2546_v48, 0.0 }
 0x4cf   : > { %v3233_v59 = vpack.c.bf16 %v2562_v44, %v2561_v29 }
 0x4d0   : > { %v2496_v52 = vpop.f32.mrf.mxu1 }
 0x4d1   : > { %3252 = vst [vmem:[%s4005_s20 + $0x30] sm:$0xff] %v3233_v59   ;;  %v2497_v63 = vadd.f32 %v4609_v10, %v2496_v52 }
 0x4d3   : > { %v2547_v56 = vadd.f32 %v3198_v33, %v2497_v63 }
 0x4d5   : > { %v2563_v0 = vmax.f32 %v2547_v56, 0.0 }
 0x4d8   : > { %v2498_v23 = vpop.f32.mrf.mxu1 }
 0x4d9   : > { %v2499_v9 = vadd.f32 %v4609_v10, %v2498_v23 }
 0x4db   : > { %v2548_v2 = vadd.f32 %v3199_v31, %v2499_v9 }
 0x4dd   : > { %v2564_v15 = vmax.f32 %v2548_v2, 0.0 }
 0x4df   : > { %v3238_v53 = vpack.c.bf16 %v2564_v15, %v2563_v0 }
 0x4e1   : > { %3253 = vst [vmem:[%s4005_s20 + $0x38] sm:$0xff] %v3238_v53  }
 0x4e2   : > { %3492 = shalt.err (!%p3489_p8)
}
 0x4e3   : > { %s3597_s4 = smov 64   ;;  %s3598_s20 = smov 4  }
 0x4e4   : > { %3288 = dma.vmem_to_hbm [thread:$0]  (%p3709_p6), %s2614_s19, 1024, %s2616_s13, %s2598_s22, %s3597_s4, %s3597_s4, %s3598_s20  }
 0x4e5 PF: > { %s4756_s24 = sld [smem:[#allocation12_spill]]  ;;  %p3305_p9 = scmp.ge.s32.totalorder %s3591_s11, 2 }
 0x4e7   : > { %p3299_p12 = pnand %p3305_p9, %p3715_p10 }
 0x4e9   : > { %p3300_p13 = pneg %p3299_p12 }
 0x4eb   : > { %s2630_s5 = sand.u32 1, %s4756_s24  }
 0x4ec   : > { %s2631_s27 = scalar_lea.sflag [#allocation5], %s2630_s5 }
 0x4ed   : > { %3546 = dma.done.wait (%p3300_p13), %s2631_s27, 1024  }
 0x4ee   : > { %3548 = vsyncadd (%p3300_p13), %s2631_s27, 4294966272  ;;  %s24_s11 = sadd.s32 1, %s3591_s11   ;;  %s4758_s30 = sld [smem:[#allocation14_spill]] }
 0x4ef   : > { %p21_p1 = scmp.ge.s32.totalorder %s24_s11, 6   ;;  %s4759_s9 = sld [smem:[#allocation17_spill]] }
 0x4f0   : > { %s4760_s14 = sld [smem:[#allocation18_spill]]  ;;  %s4761_s24 = smov %s3555_s25 }
 0x4f1   : > { %s4762_s25 = smov %s3559_s26  ;;  %s4763_s26 = smov %s3760_s7 }
 0x4f2   : > { %s4764_s27 = smov %s3567_s28  ;;  %s4765_s28 = smov %s3571_s29 }
 0x4f3   : > { %s4766_s29 = smov %s3757_s16  ;;  %s4767_s8 = smov %s3587_s10 }
 0x4f4   :  { %23 = sbr.rel (!%p21_p1) target bundleno = 16 (0x10), region = 118 }
 0x4f6   : > { %s4768_s10 = smov %s4760_s14 }
 0x4f9   :  { %2637 = vsyncpa [#allocation4], 1 }
 0x4fa   :  { %2639 = vsyncpa [#allocation4 + $0x1], 1 }
 0x4fb   :  { %2640 = vsyncpa [#allocation7], 1 }
 0x4fc   :  { %2641 = vsyncpa [#allocation5], 1 }
 0x4fd   :  { %2643 = vsyncpa [#allocation5 + $0x1], 1 }

</bundles_post_ra>
